<compile_context>
chip_gen: v7x
topology: tpu7x:2x2x1
jax: 0.10.0
libtpu: 0.0.40
codegen_flags: <defaults>
</compile_context>

<pallas_src>
import functools

import jax
import jax.numpy as jnp
import numpy as np
from jax.experimental import pallas as pl
from jax.experimental.pallas import tpu as pltpu


def _round_up(a, b):
    return (a + b - 1) // b * b


# --------------------------------------------------------------------------- #
# Kernel
# --------------------------------------------------------------------------- #
def moe_kernel(x_ref, gw_ref, gb_ref, wall_ref, ball_ref, out_ref, *,
               num_experts, dout_pad, expert_group):
    x = x_ref[...]                                             # (TILE_N, Din_pad)
    E = num_experts
    n = x.shape[0]

    # ---- gate: linear + softmax over experts (f32 score path) ----
    logits = jnp.dot(x, gw_ref[...],
                     preferred_element_type=jnp.float32) + gb_ref[...]  # (TILE_N, E)
    mx = jnp.max(logits, axis=-1, keepdims=True)
    ex = jnp.exp(logits - mx)
    # exact reciprocal keeps the 1e-5 check tight (approx=True ~1e-3 rel err).
    scores = ex * pl.reciprocal(jnp.sum(ex, axis=-1, keepdims=True), approx=False)

    # ---- top-2 membership: two-pass max, lower-index tie-break (O(E*N)) ----
    col = jax.lax.broadcasted_iota(jnp.int32, (n, E), 1)
    m1 = jnp.max(scores, axis=-1, keepdims=True)
    i1 = jnp.min(jnp.where(scores == m1, col, E), axis=-1, keepdims=True)
    sel1 = col == i1
    rest = jnp.where(sel1, -jnp.inf, scores)
    m2 = jnp.max(rest, axis=-1, keepdims=True)
    i2 = jnp.min(jnp.where(rest == m2, col, E), axis=-1, keepdims=True)
    sel2 = col == i2
    g = jnp.where(sel1 | sel2, scores, 0.0)                    # (TILE_N, E) mask*score

    # ---- bias of every expert in one small dot: sum_i b_i * s_i ----
    # (unmasked score: matches the reference, where the bias is applied to the
    #  masked-zero input and then scaled by the gate score.)
    acc = jnp.dot(scores, ball_ref[...],
                  preferred_element_type=jnp.float32)          # (TILE_N, Dout_pad)

    # ---- expert matmuls on static slices of the fused weight ref ----
    # No (TILE_N, E*Dout_pad) temporary is materialized: each group of
    # `expert_group` experts (>=256 output lanes per MXU call on v6e/v7x)
    # is matmul'ed and folded into the accumulator immediately.
    for g0 in range(0, E, expert_group):
        g1 = min(g0 + expert_group, E)
        w_blk = wall_ref[:, g0 * dout_pad:g1 * dout_pad]       # static slice
        y = jnp.dot(x, w_blk, preferred_element_type=jnp.float32)
        for i in range(g0, g1):
            off = (i - g0) * dout_pad
            acc = acc + y[:, off:off + dout_pad] * g[:, i:i + 1]

    out_ref[...] = acc.astype(out_ref.dtype)


# --------------------------------------------------------------------------- #
# Weight packing (call ONCE; reuse across forward calls)
# --------------------------------------------------------------------------- #
def pack_moe_params(gate_w, gate_b, expert_w, expert_b, *,
                    compute_dtype=jnp.float32, lane_align=128):
    """Pad/pack weights once.  Per-call repacking would re-read every expert
    weight from HBM on every step, dwarfing the kernel's own traffic."""
    Din, E = gate_w.shape
    Dout = expert_w.shape[-1]
    dtype = jnp.dtype(compute_dtype)
    din_pad = _round_up(Din, 128)
    dout_pad = _round_up(Dout, lane_align)

    gw = jnp.zeros((din_pad, E), dtype).at[:Din, :].set(gate_w.astype(dtype))
    gb = gate_b.reshape(1, E).astype(jnp.float32)

    # fused expert weights: (Din_pad, E*Dout_pad); expert i owns a 128-aligned slab
    w_pad = jnp.pad(expert_w.astype(dtype), ((0, 0), (0, 0), (0, dout_pad - Dout)))
    wall = jnp.zeros((din_pad, E * dout_pad), dtype).at[:Din, :].set(
        w_pad.transpose(1, 0, 2).reshape(Din, E * dout_pad))
    ball = jnp.pad(expert_b.reshape(E, Dout).astype(jnp.float32),
                   ((0, 0), (0, dout_pad - Dout)))             # (E, Dout_pad)

    return dict(gw=gw, gb=gb, wall=wall, ball=ball, dtype=dtype,
                din=Din, dout=Dout, num_experts=E,
                din_pad=din_pad, dout_pad=dout_pad)


# --------------------------------------------------------------------------- #
# pallas_call builder + forward
# --------------------------------------------------------------------------- #
def _build_moe_call(*, n_pad, tile_n, din_pad, dout_pad, num_experts,
                    expert_group, out_dtype, vmem_limit_bytes,
                    single_buffer_weights):
    E = num_experts
    kernel = functools.partial(moe_kernel, num_experts=E, dout_pad=dout_pad,
                               expert_group=expert_group)

    def weight_spec(shape):
        # grid-invariant operands: constant index_map -> a single VMEM buffer
        # suffices; this halves the resident weight footprint.
        if single_buffer_weights:
            return pl.BlockSpec(shape, lambda i: (0, 0),
                                pipeline_mode=pl.Buffered(1))
        return pl.BlockSpec(shape, lambda i: (0, 0))

    return pl.pallas_call(
        kernel,
        out_shape=jax.ShapeDtypeStruct((n_pad, dout_pad), out_dtype),
        grid_spec=pltpu.PrefetchScalarGridSpec(
            num_scalar_prefetch=0,
            grid=(n_pad // tile_n,),
            in_specs=[
                pl.BlockSpec((tile_n, din_pad), lambda i: (i, 0)),   # x tile (pipelined)
                weight_spec((din_pad, E)),                           # gate W  (resident)
                weight_spec((1, E)),                                 # gate b  (resident)
                weight_spec((din_pad, E * dout_pad)),                # fused expert W
                weight_spec((E, dout_pad)),                          # fused expert b
            ],
            out_specs=pl.BlockSpec((tile_n, dout_pad), lambda i: (i, 0)),
        ),
        compiler_params=pltpu.CompilerParams(
            dimension_semantics=("parallel",),      # shard token axis across TCs
            vmem_limit_bytes=vmem_limit_bytes),
    )


def moe_forward(x, packed, *, max_tile_n=512, min_grid_steps=2):
    B, S, Din_x = x.shape
    Din, Dout, E = packed["din"], packed["dout"], packed["num_experts"]
    assert Din_x == Din
    din_pad, dout_pad = packed["din_pad"], packed["dout_pad"]
    dtype = packed["dtype"]
    out_dtype = x.dtype
    N = B * S
    w_item = dtype.itemsize
    o_item = jnp.dtype(out_dtype).itemsize

    # ---- tile_n from an explicit VMEM budget (v7x: 64 MiB physical) ----
    weight_bytes = ((packed["wall"].size + packed["gw"].size) * w_item
                    + (packed["gb"].size + packed["ball"].size) * 4)
    per_row_bytes = 2 * (din_pad * w_item + dout_pad * o_item)   # double-buffered x/out
    vmem_budget = 48 * 1024 * 1024
    tile_cap = max(8, (vmem_budget - 2 * weight_bytes) // max(per_row_bytes, 1))
    tile_n = max(8, min(max_tile_n, _round_up(N, 8), int(tile_cap) // 8 * 8))
    # ensure >=2 grid steps so ("parallel",) can engage both v7x TensorCores
    if N > 8 and pl.cdiv(N, tile_n) < min_grid_steps:
        tile_n = max(8, _round_up(pl.cdiv(N, min_grid_steps), 8))
    if dtype == jnp.bfloat16:
        tile_n = _round_up(tile_n, 16)         # dense sublane packing for bf16
    n_pad = _round_up(N, tile_n)

    # group experts so each MXU call sees >=256 output lanes on v6e/v7x
    expert_group = max(1, 256 // dout_pad)

    needed = (2 * weight_bytes
              + 2 * tile_n * (din_pad * w_item + dout_pad * o_item)
              + (1 << 20))
    vmem_limit_bytes = int(min(max(needed, 32 << 20), 56 << 20))

    # ---- only activations are padded per call ----
    x2 = jnp.zeros((n_pad, din_pad), dtype).at[:N, :Din].set(
        x.reshape(N, Din).astype(dtype))
    args = (x2, packed["gw"], packed["gb"], packed["wall"], packed["ball"])
    common = dict(n_pad=n_pad, tile_n=tile_n, din_pad=din_pad, dout_pad=dout_pad,
                  num_experts=E, expert_group=expert_group, out_dtype=out_dtype,
                  vmem_limit_bytes=vmem_limit_bytes)
    try:
        out = jax.block_until_ready(
            _build_moe_call(single_buffer_weights=True, **common)(*args))
    except Exception:
        # pipeline_mode=pl.Buffered(1) not supported by this jax version:
        # fall back to default double-buffered weight specs (same numerics).
        out = _build_moe_call(single_buffer_weights=False, **common)(*args)

    return out[:N, :Dout].reshape(B, S, Dout)


# --------------------------------------------------------------------------- #
# Pure-JAX reference (intended semantics)
# --------------------------------------------------------------------------- #
def moe_reference(x, gate_w, gate_b, expert_w, expert_b):
    logits = jnp.einsum("bsd,de->bse", x, gate_w) + gate_b
    scores = jax.nn.softmax(logits, axis=-1)
    top2 = jax.lax.top_k(scores, 2)[1]
    out = jnp.zeros(x.shape[:-1] + (expert_w.shape[-1],), x.dtype)
    for i in range(expert_w.shape[0]):
        mask = jnp.any(top2 == i, axis=-1)[..., None].astype(x.dtype)
        eo = jnp.einsum("bsd,do->bso", x * mask, expert_w[i]) + expert_b[i]
        out = out + eo * scores[..., i:i + 1]
    return out


if __name__ == "__main__":
    input_dim, output_dim, num_experts = 5, 3, 4
    batch_size, seq_len = 2, 10

    key = jax.random.PRNGKey(0)
    kx, kgw, kgb, kew, keb = jax.random.split(key, 5)

    x = jax.random.normal(kx, (batch_size, seq_len, input_dim), jnp.float32)

    gbound = 1.0 / np.sqrt(input_dim)
    gate_w = jax.random.uniform(kgw, (input_dim, num_experts), jnp.float32, -gbound, gbound)
    gate_b = jax.random.uniform(kgb, (num_experts,), jnp.float32, -gbound, gbound)
    expert_w = jax.random.uniform(
        kew, (num_experts, input_dim, output_dim), jnp.float32, -gbound, gbound)
    expert_b = jax.random.uniform(
        keb, (num_experts, output_dim), jnp.float32, -gbound, gbound)

    # pack/pad weights ONCE (hoisted out of the per-call path); f32 compute so
    # the 1e-5 check against the f32 reference holds.  Pass
    # compute_dtype=jnp.bfloat16 for 2x MXU throughput at production shapes.
    packed = pack_moe_params(gate_w, gate_b, expert_w, expert_b,
                             compute_dtype=jnp.float32)

    out = jax.block_until_ready(moe_forward(x, packed))
    ref = jax.block_until_ready(moe_reference(x, gate_w, gate_b, expert_w, expert_b))

    assert out.shape == (batch_size, seq_len, output_dim)
    assert out.dtype == x.dtype
    assert np.allclose(np.asarray(out), np.asarray(ref), atol=1e-5, rtol=1e-5)
    print("KERNEL_OK")
</pallas_src>

<mosaic_0001>
module attributes {stable_mosaic.version = 11 : i64} {
  func.func @moe_kernel(%arg0: i32, %arg1: memref<16x128xf32, #tpu.memory_space<vmem>>, %arg2: memref<128x4xf32, #tpu.memory_space<vmem>>, %arg3: memref<1x4xf32, #tpu.memory_space<vmem>>, %arg4: memref<128x512xf32, #tpu.memory_space<vmem>>, %arg5: memref<4x128xf32, #tpu.memory_space<vmem>>, %arg6: memref<16x128xf32, #tpu.memory_space<vmem>>) attributes {dimension_semantics = [#tpu.dimension_semantics<parallel>], iteration_bounds = array<i64: 2>, scalar_prefetch = 0 : i64, scratch_operands = 0 : i64, tpu.core_type = #tpu.core_type<tc>, window_params = [{transform_indices = @transform_0, window_bounds = array<i64: 16, 128>}, {pipeline_mode = #tpu.pipeline_mode<synchronous>, transform_indices = @transform_1, window_bounds = array<i64: 128, 4>}, {pipeline_mode = #tpu.pipeline_mode<synchronous>, transform_indices = @transform_2, window_bounds = array<i64: 1, 4>}, {pipeline_mode = #tpu.pipeline_mode<synchronous>, transform_indices = @transform_3, window_bounds = array<i64: 128, 512>}, {pipeline_mode = #tpu.pipeline_mode<synchronous>, transform_indices = @transform_4, window_bounds = array<i64: 4, 128>}, {transform_indices = @transform_5, window_bounds = array<i64: 16, 128>}]} {
    %c0 = arith.constant 0 : index
    %c0_0 = arith.constant 0 : index
    %0 = vector.load %arg1[%c0, %c0_0] : memref<16x128xf32, #tpu.memory_space<vmem>>, vector<16x128xf32>
    %c0_1 = arith.constant 0 : index
    %c0_2 = arith.constant 0 : index
    %1 = vector.load %arg2[%c0_1, %c0_2] : memref<128x4xf32, #tpu.memory_space<vmem>>, vector<128x4xf32>
    %cst = arith.constant dense<0.000000e+00> : vector<16x4xf32>
    %2 = tpu.matmul %0, %1, %cst {dimension_numbers = #tpu.dot_dimension_numbers<[1], [0], [0], [1], [0, 0, 1, 1], [], []>} : vector<16x128xf32>, vector<128x4xf32>, vector<16x4xf32> -> vector<16x4xf32>
    %c0_3 = arith.constant 0 : index
    %c0_4 = arith.constant 0 : index
    %3 = vector.load %arg3[%c0_3, %c0_4] : memref<1x4xf32, #tpu.memory_space<vmem>>, vector<1x4xf32>
    %4 = vector.broadcast %3 : vector<1x4xf32> to vector<16x4xf32>
    %5 = arith.addf %2, %4 : vector<16x4xf32>
    %cst_5 = arith.constant dense<0xFF800000> : vector<16xf32>
    %6 = vector.multi_reduction <maximumf>, %5, %cst_5 [1] : vector<16x4xf32> to vector<16xf32>
    %7 = vector.shape_cast %6 : vector<16xf32> to vector<16x1xf32>
    %8 = vector.broadcast %7 : vector<16x1xf32> to vector<16x4xf32>
    %9 = arith.subf %5, %8 : vector<16x4xf32>
    %10 = math.exp %9 : vector<16x4xf32>
    %cst_6 = arith.constant dense<0.000000e+00> : vector<16xf32>
    %11 = vector.multi_reduction <add>, %10, %cst_6 [1] : vector<16x4xf32> to vector<16xf32>
    %12 = vector.shape_cast %11 : vector<16xf32> to vector<16x1xf32>
    %13 = tpu.reciprocal %12 : vector<16x1xf32> -> vector<16x1xf32>
    %14 = vector.broadcast %13 : vector<16x1xf32> to vector<16x4xf32>
    %15 = arith.mulf %10, %14 : vector<16x4xf32>
    %16 = tpu.iota {dimensions = array<i32: 1>} : vector<16x4xi32>
    %cst_7 = arith.constant dense<0xFF800000> : vector<16xf32>
    %17 = vector.multi_reduction <maximumf>, %15, %cst_7 [1] : vector<16x4xf32> to vector<16xf32>
    %18 = vector.shape_cast %17 : vector<16xf32> to vector<16x1xf32>
    %19 = vector.broadcast %18 : vector<16x1xf32> to vector<16x4xf32>
    %20 = arith.cmpf oeq, %15, %19 : vector<16x4xf32>
    %c4_i32 = arith.constant 4 : i32
    %21 = vector.broadcast %c4_i32 : i32 to vector<16x4xi32>
    %22 = arith.select %20, %16, %21 : vector<16x4xi1>, vector<16x4xi32>
    %cst_8 = arith.constant dense<2147483647> : vector<16xi32>
    %23 = vector.multi_reduction <minsi>, %22, %cst_8 [1] : vector<16x4xi32> to vector<16xi32>
    %24 = vector.shape_cast %23 : vector<16xi32> to vector<16x1xi32>
    %25 = vector.broadcast %24 : vector<16x1xi32> to vector<16x4xi32>
    %26 = arith.cmpi eq, %16, %25 : vector<16x4xi32>
    %cst_9 = arith.constant 0xFF800000 : f32
    %27 = vector.broadcast %cst_9 : f32 to vector<16x4xf32>
    %28 = arith.select %26, %27, %15 : vector<16x4xi1>, vector<16x4xf32>
    %cst_10 = arith.constant dense<0xFF800000> : vector<16xf32>
    %29 = vector.multi_reduction <maximumf>, %28, %cst_10 [1] : vector<16x4xf32> to vector<16xf32>
    %30 = vector.shape_cast %29 : vector<16xf32> to vector<16x1xf32>
    %31 = vector.broadcast %30 : vector<16x1xf32> to vector<16x4xf32>
    %32 = arith.cmpf oeq, %28, %31 : vector<16x4xf32>
    %c4_i32_11 = arith.constant 4 : i32
    %33 = vector.broadcast %c4_i32_11 : i32 to vector<16x4xi32>
    %34 = arith.select %32, %16, %33 : vector<16x4xi1>, vector<16x4xi32>
    %cst_12 = arith.constant dense<2147483647> : vector<16xi32>
    %35 = vector.multi_reduction <minsi>, %34, %cst_12 [1] : vector<16x4xi32> to vector<16xi32>
    %36 = vector.shape_cast %35 : vector<16xi32> to vector<16x1xi32>
    %37 = vector.broadcast %36 : vector<16x1xi32> to vector<16x4xi32>
    %38 = arith.cmpi eq, %16, %37 : vector<16x4xi32>
    %39 = arith.ori %26, %38 : vector<16x4xi1>
    %cst_13 = arith.constant 0.000000e+00 : f32
    %40 = vector.broadcast %cst_13 : f32 to vector<16x4xf32>
    %41 = arith.select %39, %15, %40 : vector<16x4xi1>, vector<16x4xf32>
    %c0_14 = arith.constant 0 : index
    %c0_15 = arith.constant 0 : index
    %42 = vector.load %arg5[%c0_14, %c0_15] : memref<4x128xf32, #tpu.memory_space<vmem>>, vector<4x128xf32>
    %cst_16 = arith.constant dense<0.000000e+00> : vector<16x128xf32>
    %43 = tpu.matmul %15, %42, %cst_16 {dimension_numbers = #tpu.dot_dimension_numbers<[1], [0], [0], [1], [0, 0, 1, 1], [], []>} : vector<16x4xf32>, vector<4x128xf32>, vector<16x128xf32> -> vector<16x128xf32>
    %c0_17 = arith.constant 0 : index
    %c0_18 = arith.constant 0 : index
    %44 = vector.load %arg4[%c0_17, %c0_18] : memref<128x512xf32, #tpu.memory_space<vmem>>, vector<128x256xf32>
    %cst_19 = arith.constant dense<0.000000e+00> : vector<16x256xf32>
    %45 = tpu.matmul %0, %44, %cst_19 {dimension_numbers = #tpu.dot_dimension_numbers<[1], [0], [0], [1], [0, 0, 1, 1], [], []>} : vector<16x128xf32>, vector<128x256xf32>, vector<16x256xf32> -> vector<16x256xf32>
    %46 = vector.extract_strided_slice %45 {offsets = [0, 0], sizes = [16, 128], strides = [1, 1]} : vector<16x256xf32> to vector<16x128xf32>
    %47 = vector.extract_strided_slice %41 {offsets = [0, 0], sizes = [16, 1], strides = [1, 1]} : vector<16x4xf32> to vector<16x1xf32>
    %48 = vector.broadcast %47 : vector<16x1xf32> to vector<16x128xf32>
    %49 = arith.mulf %46, %48 : vector<16x128xf32>
    %50 = arith.addf %43, %49 : vector<16x128xf32>
    %51 = vector.extract_strided_slice %45 {offsets = [0, 128], sizes = [16, 128], strides = [1, 1]} : vector<16x256xf32> to vector<16x128xf32>
    %52 = vector.extract_strided_slice %41 {offsets = [0, 1], sizes = [16, 1], strides = [1, 1]} : vector<16x4xf32> to vector<16x1xf32>
    %53 = vector.broadcast %52 : vector<16x1xf32> to vector<16x128xf32>
    %54 = arith.mulf %51, %53 : vector<16x128xf32>
    %55 = arith.addf %50, %54 : vector<16x128xf32>
    %c0_20 = arith.constant 0 : index
    %c256 = arith.constant 256 : index
    %56 = vector.load %arg4[%c0_20, %c256] : memref<128x512xf32, #tpu.memory_space<vmem>>, vector<128x256xf32>
    %cst_21 = arith.constant dense<0.000000e+00> : vector<16x256xf32>
    %57 = tpu.matmul %0, %56, %cst_21 {dimension_numbers = #tpu.dot_dimension_numbers<[1], [0], [0], [1], [0, 0, 1, 1], [], []>} : vector<16x128xf32>, vector<128x256xf32>, vector<16x256xf32> -> vector<16x256xf32>
    %58 = vector.extract_strided_slice %57 {offsets = [0, 0], sizes = [16, 128], strides = [1, 1]} : vector<16x256xf32> to vector<16x128xf32>
    %59 = vector.extract_strided_slice %41 {offsets = [0, 2], sizes = [16, 1], strides = [1, 1]} : vector<16x4xf32> to vector<16x1xf32>
    %60 = vector.broadcast %59 : vector<16x1xf32> to vector<16x128xf32>
    %61 = arith.mulf %58, %60 : vector<16x128xf32>
    %62 = arith.addf %55, %61 : vector<16x128xf32>
    %63 = vector.extract_strided_slice %57 {offsets = [0, 128], sizes = [16, 128], strides = [1, 1]} : vector<16x256xf32> to vector<16x128xf32>
    %64 = vector.extract_strided_slice %41 {offsets = [0, 3], sizes = [16, 1], strides = [1, 1]} : vector<16x4xf32> to vector<16x1xf32>
    %65 = vector.broadcast %64 : vector<16x1xf32> to vector<16x128xf32>
    %66 = arith.mulf %63, %65 : vector<16x128xf32>
    %67 = arith.addf %62, %66 : vector<16x128xf32>
    %c0_22 = arith.constant 0 : index
    %c0_23 = arith.constant 0 : index
    %68 = vector.load %arg6[%c0_22, %c0_23] : memref<16x128xf32, #tpu.memory_space<vmem>>, vector<16x128xf32>
    tpu.vector_store %arg6[%c0_22, %c0_23], %67 {strides = array<i32>} : memref<16x128xf32, #tpu.memory_space<vmem>>, vector<16x128xf32>,
    return
  }
  func.func @transform_0(%arg0: i32) -> (i32, i32) {
    %c0_i32 = arith.constant 0 : i32
    %c0_i32_0 = arith.constant 0 : i32
    return %arg0, %c0_i32 : i32, i32
  }
  func.func @transform_1(%arg0: i32) -> (i32, i32) {
    %c0_i32 = arith.constant 0 : i32
    %c0_i32_0 = arith.constant 0 : i32
    %c0_i32_1 = arith.constant 0 : i32
    return %c0_i32, %c0_i32_0 : i32, i32
  }
  func.func @transform_2(%arg0: i32) -> (i32, i32) {
    %c0_i32 = arith.constant 0 : i32
    %c0_i32_0 = arith.constant 0 : i32
    %c0_i32_1 = arith.constant 0 : i32
    return %c0_i32, %c0_i32_0 : i32, i32
  }
  func.func @transform_3(%arg0: i32) -> (i32, i32) {
    %c0_i32 = arith.constant 0 : i32
    %c0_i32_0 = arith.constant 0 : i32
    %c0_i32_1 = arith.constant 0 : i32
    return %c0_i32, %c0_i32_0 : i32, i32
  }
  func.func @transform_4(%arg0: i32) -> (i32, i32) {
    %c0_i32 = arith.constant 0 : i32
    %c0_i32_0 = arith.constant 0 : i32
    %c0_i32_1 = arith.constant 0 : i32
    return %c0_i32, %c0_i32_0 : i32, i32
  }
  func.func @transform_5(%arg0: i32) -> (i32, i32) {
    %c0_i32 = arith.constant 0 : i32
    %c0_i32_0 = arith.constant 0 : i32
    return %arg0, %c0_i32 : i32, i32
  }
}

module attributes {stable_mosaic.version = 11 : i64} {
  func.func @moe_kernel(%arg0: i32, %arg1: memref<16x128xf32, #tpu.memory_space<vmem>>, %arg2: memref<128x4xf32, #tpu.memory_space<vmem>>, %arg3: memref<1x4xf32, #tpu.memory_space<vmem>>, %arg4: memref<128x512xf32, #tpu.memory_space<vmem>>, %arg5: memref<4x128xf32, #tpu.memory_space<vmem>>, %arg6: memref<16x128xf32, #tpu.memory_space<vmem>>) attributes {dimension_semantics = [#tpu.dimension_semantics<parallel>], iteration_bounds = array<i64: 2>, scalar_prefetch = 0 : i64, scratch_operands = 0 : i64, tpu.core_type = #tpu.core_type<tc>, window_params = [{transform_indices = @transform_0, window_bounds = array<i64: 16, 128>}, {pipeline_mode = #tpu.pipeline_mode<synchronous>, transform_indices = @transform_1, window_bounds = array<i64: 128, 4>}, {pipeline_mode = #tpu.pipeline_mode<synchronous>, transform_indices = @transform_2, window_bounds = array<i64: 1, 4>}, {pipeline_mode = #tpu.pipeline_mode<synchronous>, transform_indices = @transform_3, window_bounds = array<i64: 128, 512>}, {pipeline_mode = #tpu.pipeline_mode<synchronous>, transform_indices = @transform_4, window_bounds = array<i64: 4, 128>}, {transform_indices = @transform_5, window_bounds = array<i64: 16, 128>}]} {
    %c0 = arith.constant 0 : index
    %c0_0 = arith.constant 0 : index
    %0 = vector.load %arg1[%c0, %c0_0] : memref<16x128xf32, #tpu.memory_space<vmem>>, vector<16x128xf32>
    %c0_1 = arith.constant 0 : index
    %c0_2 = arith.constant 0 : index
    %1 = vector.load %arg2[%c0_1, %c0_2] : memref<128x4xf32, #tpu.memory_space<vmem>>, vector<128x4xf32>
    %cst = arith.constant dense<0.000000e+00> : vector<16x4xf32>
    %2 = tpu.matmul %0, %1, %cst {dimension_numbers = #tpu.dot_dimension_numbers<[1], [0], [0], [1], [0, 0, 1, 1], [], []>} : vector<16x128xf32>, vector<128x4xf32>, vector<16x4xf32> -> vector<16x4xf32>
    %c0_3 = arith.constant 0 : index
    %c0_4 = arith.constant 0 : index
    %3 = vector.load %arg3[%c0_3, %c0_4] : memref<1x4xf32, #tpu.memory_space<vmem>>, vector<1x4xf32>
    %4 = vector.broadcast %3 : vector<1x4xf32> to vector<16x4xf32>
    %5 = arith.addf %2, %4 : vector<16x4xf32>
    %cst_5 = arith.constant dense<0xFF800000> : vector<16xf32>
    %6 = vector.multi_reduction <maximumf>, %5, %cst_5 [1] : vector<16x4xf32> to vector<16xf32>
    %7 = vector.shape_cast %6 : vector<16xf32> to vector<16x1xf32>
    %8 = vector.broadcast %7 : vector<16x1xf32> to vector<16x4xf32>
    %9 = arith.subf %5, %8 : vector<16x4xf32>
    %10 = math.exp %9 : vector<16x4xf32>
    %cst_6 = arith.constant dense<0.000000e+00> : vector<16xf32>
    %11 = vector.multi_reduction <add>, %10, %cst_6 [1] : vector<16x4xf32> to vector<16xf32>
    %12 = vector.shape_cast %11 : vector<16xf32> to vector<16x1xf32>
    %13 = tpu.reciprocal %12 : vector<16x1xf32> -> vector<16x1xf32>
    %14 = vector.broadcast %13 : vector<16x1xf32> to vector<16x4xf32>
    %15 = arith.mulf %10, %14 : vector<16x4xf32>
    %16 = tpu.iota {dimensions = array<i32: 1>} : vector<16x4xi32>
    %cst_7 = arith.constant dense<0xFF800000> : vector<16xf32>
    %17 = vector.multi_reduction <maximumf>, %15, %cst_7 [1] : vector<16x4xf32> to vector<16xf32>
    %18 = vector.shape_cast %17 : vector<16xf32> to vector<16x1xf32>
    %19 = vector.broadcast %18 : vector<16x1xf32> to vector<16x4xf32>
    %20 = arith.cmpf oeq, %15, %19 : vector<16x4xf32>
    %c4_i32 = arith.constant 4 : i32
    %21 = vector.broadcast %c4_i32 : i32 to vector<16x4xi32>
    %22 = arith.select %20, %16, %21 : vector<16x4xi1>, vector<16x4xi32>
    %cst_8 = arith.constant dense<2147483647> : vector<16xi32>
    %23 = vector.multi_reduction <minsi>, %22, %cst_8 [1] : vector<16x4xi32> to vector<16xi32>
    %24 = vector.shape_cast %23 : vector<16xi32> to vector<16x1xi32>
    %25 = vector.broadcast %24 : vector<16x1xi32> to vector<16x4xi32>
    %26 = arith.cmpi eq, %16, %25 : vector<16x4xi32>
    %cst_9 = arith.constant 0xFF800000 : f32
    %27 = vector.broadcast %cst_9 : f32 to vector<16x4xf32>
    %28 = arith.select %26, %27, %15 : vector<16x4xi1>, vector<16x4xf32>
    %cst_10 = arith.constant dense<0xFF800000> : vector<16xf32>
    %29 = vector.multi_reduction <maximumf>, %28, %cst_10 [1] : vector<16x4xf32> to vector<16xf32>
    %30 = vector.shape_cast %29 : vector<16xf32> to vector<16x1xf32>
    %31 = vector.broadcast %30 : vector<16x1xf32> to vector<16x4xf32>
    %32 = arith.cmpf oeq, %28, %31 : vector<16x4xf32>
    %c4_i32_11 = arith.constant 4 : i32
    %33 = vector.broadcast %c4_i32_11 : i32 to vector<16x4xi32>
    %34 = arith.select %32, %16, %33 : vector<16x4xi1>, vector<16x4xi32>
    %cst_12 = arith.constant dense<2147483647> : vector<16xi32>
    %35 = vector.multi_reduction <minsi>, %34, %cst_12 [1] : vector<16x4xi32> to vector<16xi32>
    %36 = vector.shape_cast %35 : vector<16xi32> to vector<16x1xi32>
    %37 = vector.broadcast %36 : vector<16x1xi32> to vector<16x4xi32>
    %38 = arith.cmpi eq, %16, %37 : vector<16x4xi32>
    %39 = arith.ori %26, %38 : vector<16x4xi1>
    %cst_13 = arith.constant 0.000000e+00 : f32
    %40 = vector.broadcast %cst_13 : f32 to vector<16x4xf32>
    %41 = arith.select %39, %15, %40 : vector<16x4xi1>, vector<16x4xf32>
    %c0_14 = arith.constant 0 : index
    %c0_15 = arith.constant 0 : index
    %42 = vector.load %arg5[%c0_14, %c0_15] : memref<4x128xf32, #tpu.memory_space<vmem>>, vector<4x128xf32>
    %cst_16 = arith.constant dense<0.000000e+00> : vector<16x128xf32>
    %43 = tpu.matmul %15, %42, %cst_16 {dimension_numbers = #tpu.dot_dimension_numbers<[1], [0], [0], [1], [0, 0, 1, 1], [], []>} : vector<16x4xf32>, vector<4x128xf32>, vector<16x128xf32> -> vector<16x128xf32>
    %c0_17 = arith.constant 0 : index
    %c0_18 = arith.constant 0 : index
    %44 = vector.load %arg4[%c0_17, %c0_18] : memref<128x512xf32, #tpu.memory_space<vmem>>, vector<128x256xf32>
    %cst_19 = arith.constant dense<0.000000e+00> : vector<16x256xf32>
    %45 = tpu.matmul %0, %44, %cst_19 {dimension_numbers = #tpu.dot_dimension_numbers<[1], [0], [0], [1], [0, 0, 1, 1], [], []>} : vector<16x128xf32>, vector<128x256xf32>, vector<16x256xf32> -> vector<16x256xf32>
    %46 = vector.extract_strided_slice %45 {offsets = [0, 0], sizes = [16, 128], strides = [1, 1]} : vector<16x256xf32> to vector<16x128xf32>
    %47 = vector.extract_strided_slice %41 {offsets = [0, 0], sizes = [16, 1], strides = [1, 1]} : vector<16x4xf32> to vector<16x1xf32>
    %48 = vector.broadcast %47 : vector<16x1xf32> to vector<16x128xf32>
    %49 = arith.mulf %46, %48 : vector<16x128xf32>
    %50 = arith.addf %43, %49 : vector<16x128xf32>
    %51 = vector.extract_strided_slice %45 {offsets = [0, 128], sizes = [16, 128], strides = [1, 1]} : vector<16x256xf32> to vector<16x128xf32>
    %52 = vector.extract_strided_slice %41 {offsets = [0, 1], sizes = [16, 1], strides = [1, 1]} : vector<16x4xf32> to vector<16x1xf32>
    %53 = vector.broadcast %52 : vector<16x1xf32> to vector<16x128xf32>
    %54 = arith.mulf %51, %53 : vector<16x128xf32>
    %55 = arith.addf %50, %54 : vector<16x128xf32>
    %c0_20 = arith.constant 0 : index
    %c256 = arith.constant 256 : index
    %56 = vector.load %arg4[%c0_20, %c256] : memref<128x512xf32, #tpu.memory_space<vmem>>, vector<128x256xf32>
    %cst_21 = arith.constant dense<0.000000e+00> : vector<16x256xf32>
    %57 = tpu.matmul %0, %56, %cst_21 {dimension_numbers = #tpu.dot_dimension_numbers<[1], [0], [0], [1], [0, 0, 1, 1], [], []>} : vector<16x128xf32>, vector<128x256xf32>, vector<16x256xf32> -> vector<16x256xf32>
    %58 = vector.extract_strided_slice %57 {offsets = [0, 0], sizes = [16, 128], strides = [1, 1]} : vector<16x256xf32> to vector<16x128xf32>
    %59 = vector.extract_strided_slice %41 {offsets = [0, 2], sizes = [16, 1], strides = [1, 1]} : vector<16x4xf32> to vector<16x1xf32>
    %60 = vector.broadcast %59 : vector<16x1xf32> to vector<16x128xf32>
    %61 = arith.mulf %58, %60 : vector<16x128xf32>
    %62 = arith.addf %55, %61 : vector<16x128xf32>
    %63 = vector.extract_strided_slice %57 {offsets = [0, 128], sizes = [16, 128], strides = [1, 1]} : vector<16x256xf32> to vector<16x128xf32>
    %64 = vector.extract_strided_slice %41 {offsets = [0, 3], sizes = [16, 1], strides = [1, 1]} : vector<16x4xf32> to vector<16x1xf32>
    %65 = vector.broadcast %64 : vector<16x1xf32> to vector<16x128xf32>
    %66 = arith.mulf %63, %65 : vector<16x128xf32>
    %67 = arith.addf %62, %66 : vector<16x128xf32>
    %c0_22 = arith.constant 0 : index
    %c0_23 = arith.constant 0 : index
    %68 = vector.load %arg6[%c0_22, %c0_23] : memref<16x128xf32, #tpu.memory_space<vmem>>, vector<16x128xf32>
    tpu.vector_store %arg6[%c0_22, %c0_23], %67 {strides = array<i32>} : memref<16x128xf32, #tpu.memory_space<vmem>>, vector<16x128xf32>,
    return
  }
  func.func @transform_0(%arg0: i32) -> (i32, i32) {
    %c0_i32 = arith.constant 0 : i32
    %c0_i32_0 = arith.constant 0 : i32
    return %arg0, %c0_i32 : i32, i32
  }
  func.func @transform_1(%arg0: i32) -> (i32, i32) {
    %c0_i32 = arith.constant 0 : i32
    %c0_i32_0 = arith.constant 0 : i32
    %c0_i32_1 = arith.constant 0 : i32
    return %c0_i32, %c0_i32_0 : i32, i32
  }
  func.func @transform_2(%arg0: i32) -> (i32, i32) {
    %c0_i32 = arith.constant 0 : i32
    %c0_i32_0 = arith.constant 0 : i32
    %c0_i32_1 = arith.constant 0 : i32
    return %c0_i32, %c0_i32_0 : i32, i32
  }
  func.func @transform_3(%arg0: i32) -> (i32, i32) {
    %c0_i32 = arith.constant 0 : i32
    %c0_i32_0 = arith.constant 0 : i32
    %c0_i32_1 = arith.constant 0 : i32
    return %c0_i32, %c0_i32_0 : i32, i32
  }
  func.func @transform_4(%arg0: i32) -> (i32, i32) {
    %c0_i32 = arith.constant 0 : i32
    %c0_i32_0 = arith.constant 0 : i32
    %c0_i32_1 = arith.constant 0 : i32
    return %c0_i32, %c0_i32_0 : i32, i32
  }
  func.func @transform_5(%arg0: i32) -> (i32, i32) {
    %c0_i32 = arith.constant 0 : i32
    %c0_i32_0 = arith.constant 0 : i32
    return %arg0, %c0_i32 : i32, i32
  }
}

</mosaic_0001>

<bundles_post_ra>
// kernel: tpu_custom_call.1
= control target key start
LH: loop header
LB: loop body
LE: loop exit
PB: predicated region body
PF: predicated region fallthrough
CT: control target
= control target key end

     0   :  { %10 = vsyncpa [#allocation3], 0  ;;  %s1573_s0 = inlined_call_operand.vmem [shape: f32[32,128], index: 0, kind: input, shape index: {}]   ;;  %s1574_s1 = inlined_call_operand.vmem [shape: f32[128,4], index: 1, kind: input, shape index: {}]   ;;  %s1575_s2 = inlined_call_operand.vmem [shape: f32[1,4], index: 2, kind: input, shape index: {}]   ;;  %s1576_s3 = inlined_call_operand.hbm [shape: f32[128,512], index: 3, kind: input, shape index: {}]   ;;  %s1577_s4 = inlined_call_operand.vmem [shape: f32[4,128], index: 4, kind: input, shape index: {}]   ;;  %s1578_s5 = inlined_call_operand.hbm [shape: f32[32,128], index: 5, kind: output, shape index: {}]  }
   0x1   :  { %11 = vsyncpa [#allocation4], 0 }
   0x2   :  { %13 = vsyncpa [#allocation4 + $0x1], 0  ;;  %s1286_s18 = smov 0   ;;  %s1288_s19 = smov 0  }
   0x3   :  { %s1290_s20 = smov 0   ;;  %s1292_s21 = smov 0  }
   0x4 LB: > { %s1307_s22 = sadd.s32 4294967295, %s1243_s21   ;;  %s898_s23 = sadd.s32 4294967294, %s1243_s21   ;;  %s1243_s21 = sphi %s1292_s21, %s1594_s21   ;;  %s1239_s20 = sphi %s1290_s20, %s1593_s20   ;;  %s1235_s19 = sphi %s1288_s19, %s1592_s19   ;;  %s1231_s18 = sphi %s1286_s18, %s1591_s18  }
   0x5   : > { %s1311_s24 = sadd.s32 1, %s1243_s21   ;;  %s136_s25 = sadd.s32 1, %s1239_s20 }
   0x6   : > { %s133_s26 = ssub.s32 %s1243_s21, %s1311_s24  ;;  %p146_p0 = scmp.ne.s32.totalorder %s1239_s20, %s1235_s19 }
   0x7   : > { %p134_p1 = scmp.eq.s32.totalorder %s133_s26, 0  ;;  %p147_p2 = scmp.eq.s32.totalorder %s1307_s22, 1 }
   0x8   : > { %p152_p3 = scmp.ne.s32.totalorder %s1235_s19, %s1231_s18  ;;  %p153_p4 = scmp.eq.s32.totalorder %s898_s23, 1 }
   0x9   : > { %s1322_s27 = scalar_select %p134_p1, %s1239_s20, %s136_s25  }
   0xa   : > { %p1324_p5 = por %p147_p2, %p146_p0  ;;  %p1328_p6 = por %p153_p4, %p152_p3 }
   0xb   : > { %p899_p7 = scmp.ge.s32.totalorder %s1243_s21, 1  ;;  %p160_p8 = scmp.lt.s32.totalorder %s1243_s21, 3 }
   0xc   : > { %s1582_s28 = scalar_select %p1324_p5, 1, 0 }
   0xd   : > { %s1583_s29 = scalar_select %p1328_p6, 1, 0 }
   0xe   : > { %p1579_p9 = scmp.eq.s32.totalorder %s1307_s22, 0  ;;  %p1335_p10 = pnand %p899_p7, %p160_p8 }
   0xf   : > { %s1245_s6 = smov [#allocation2]   ;;  %s1149_s11 = scalar_lea.hbm %s1576_s3, 8192 }
  0x10   : > { %s1584_s30 = scalar_select %p1335_p10, 1, 0 }
  0x11   : > { %s178_s7 = sshll.u32 %s1245_s6, 4  ;;  %p1080_p11 = pneg %p1335_p10  ;;  %s179_s7 = int_to_ptr.vmem [resolvable:$true] %s178_s7 }
  0x12   : > { %p1150_p13 = scmp.ne.s32.totalorder %s1576_s3, %s1149_s11  ;;  %p1156_p3 = scmp.lt.u32.totalorder %s1149_s11, %s1576_s3 }
  0x13   : > { %p1343_p12 = pnand %p1579_p9, %p1080_p11 }
  0x15   : > { %p1151_p0 = pneg %p1343_p12 }
  0x17   : > { %p1152_p1 = pnand %p1151_p0, %p1150_p13 }
  0x19   : > { %p1153_p2 = pneg %p1152_p1 }
  0x1b   : > { %p1158_p4 = pnand %p1156_p3, %p1153_p2 }
  0x1d   : > { %1161 = shalt.err (!%p1158_p4)
}
  0x1e   : > { %s1162_s16 = scalar_lea.vmem %s179_s7, 8192  ;;  %p1170_p9 = scmp.lt.s32.totalorder %s179_s7, %s179_s7 }
  0x1f   : > { %p1163_p7 = scmp.ne.s32.totalorder %s179_s7, %s1162_s16  ;;  %p1171_p6 = scmp.lt.s32.totalorder %s1162_s16, %s1162_s16 }
  0x21   : > { %p1165_p8 = pnand %p1163_p7, %p1151_p0  ;;  %p1172_p5 = por %p1171_p6, %p1170_p9 }
  0x23   : > { %p1166_p11 = pneg %p1165_p8 }
  0x25   : > { %p1173_p10 = pnand %p1172_p5, %p1166_p11 }
  0x27   : > { %1176 = shalt.err (!%p1173_p10)
}
  0x28   : > { %s1246_s17 = smov 512   ;;  %s1247_s23 = smov 32  }
  0x29   : > { %1083 = dma.hbm_to_vmem [thread:$0]  (!%p1343_p12), %s1576_s3, 8192, %s179_s7, [#allocation3], %s1246_s17, %s1246_s17, %s1247_s23  }
  0x2a   : > { %p1586_p13 = scmp.ne.s32.totalorder %s1584_s30, 0 }
  0x2b   : > { %p1587_p1 = scmp.eq.s32.totalorder (!%p1586_p13), %s1307_s22, 0 }
  0x2c   : > { %206 = sbr.rel (%p1586_p13) target bundleno = 1681 (0x691), region = 40 }
  0x33   : > { %1222 = dma.done.wait (%p1587_p1), [#allocation3], 8192   ;;  %p1588_p0 = pmov %p1587_p1 }
  0x34   : > { %s905_s6 = sshll.u32 %s1307_s22, 1  ;;  %v243_v0 = vld [vmem:[%s1574_s1] sm:$0xff]  ;;  %v244_v1 = vld [vmem:[%s1574_s1 + $0x8] sm:$0xff]  ;;  %v245_v2 = vld [vmem:[%s1574_s1 + $0x10] sm:$0xff]  ;;  %vm341_vm0 = vcmask 31744   ;;  %vm584_vm1 = vcmask 1043456   ;;  %v364_v52 = vlaneseq }
  0x35   : > { %1224 = vsyncadd (%p1588_p0), [#allocation3], 4294959104  ;;  %p235_p5 = scmp.lt.s32.totalorder %s905_s6, 3  ;;  %v978_v3 = vpack.c.bf16 %v244_v1, %v243_v0  ;;  %v246_v4 = vld [vmem:[%s1574_s1 + $0x18] sm:$0xff]  ;;  %v247_v6 = vld [vmem:[%s1574_s1 + $0x20] sm:$0xff]  ;;  %s231_s14 = sand.u32 1, %s1235_s19  }
  0x36   : > { %v982_v5 = vpack.c.bf16 %v246_v4, %v245_v2  ;;  %v248_v7 = vld [vmem:[%s1574_s1 + $0x28] sm:$0xff]  ;;  %v249_v10 = vld [vmem:[%s1574_s1 + $0x30] sm:$0xff]  ;;  %v250_v11 = vld [vmem:[%s1574_s1 + $0x38] sm:$0xff]  ;;  %v1453_v53 = vand.u32 127, %v364_v52  ;;  %s904_s15 = sshll.u32 %s231_s14, 4  ;;  %s916_s23 = sshll.u32 %s1307_s22, 8 }
  0x37   : > { %s1596_s6 = smov (!%p235_p5, %s905_s6), 3  ;;  %979 = vmatprep.subr.bf16.mxu0 %v978_v3  ;;  %v986_v8 = vpack.c.bf16 %v248_v7, %v247_v6  ;;  %v990_v12 = vpack.c.bf16 %v250_v11, %v249_v10  ;;  %v251_v13 = vld [vmem:[%s1574_s1 + $0x40] sm:$0xff]  ;;  %v252_v14 = vld [vmem:[%s1574_s1 + $0x48] sm:$0xff]  ;;  %v253_v16 = vld [vmem:[%s1574_s1 + $0x50] sm:$0xff]  ;;  %s233_s16 = scalar_lea.vmem [#allocation5], %s904_s15 }
  0x38   : > { %s906_s9 = sshll.u32 %s1596_s6, 3  ;;  %981 = vmatpush3.bf16.msra.mxu0 %v978_v3  ;;  %v994_v15 = vpack.c.bf16 %v252_v14, %v251_v13  ;;  %v254_v17 = vld [vmem:[%s1574_s1 + $0x58] sm:$0xff]  ;;  %v255_v19 = vld [vmem:[%s1574_s1 + $0x60] sm:$0xff]  ;;  %v256_v20 = vld [vmem:[%s1574_s1 + $0x68] sm:$0xff]  ;;  %s824_s17 = sshll.u32 %s233_s16, 4  ;;  %s1525_s17 = int_to_ptr.vmem [resolvable:$true] %s824_s17 }
  0x39   : > { %s1391_s6 = scalar_lea.vmem %s1573_s0, %s906_s9  ;;  %983 = vmatprep.subr.bf16.mxu0 %v982_v5  ;;  %v998_v18 = vpack.c.bf16 %v254_v17, %v253_v16  ;;  %v1002_v21 = vpack.c.bf16 %v256_v20, %v255_v19  ;;  %v257_v22 = vld [vmem:[%s1574_s1 + $0x70] sm:$0xff]  ;;  %v258_v23 = vld [vmem:[%s1574_s1 + $0x78] sm:$0xff]  ;;  %v907_v26 = vld [vmem:[%s1575_s2] ss:$0 sm:$0xff]  ;;  %s1530_s10 = scalar_lea.hbm %s1578_s5, %s916_s23 }
  0x3a   : > { %v1394_v9 = vld [vmem:[%s1391_s6] sm:$0xff]  ;;  %v1006_v24 = vpack.c.bf16 %v258_v23, %v257_v22  ;;  %v1428_v25 = vld [vmem:[%s1391_s6 + $0x8] sm:$0xff]  ;;  %s1532_s8 = scalar_lea.sflag [#allocation4], %s231_s14  ;;  %s1177_s11 = scalar_lea.vmem %s1525_s17, 256 }
  0x3b   : > { %970 = vmatprep.mubr.f32.mxu0 %v1394_v9  ;;  %v456_v43 = vld [vmem:[%s1577_s4] sm:$0xf]  ;;  %p1178_p6 = scmp.ne.s32.totalorder %s1525_s17, %s1177_s11  ;;  %p1589_p9 = scmp.ne.s32.totalorder %s1582_s28, 0 }
  0x3c   : > { %985 = vmatpush3.bf16.msra.mxu0 %v982_v5  ;;  %s1253_s22 = smov [#allocation5]  }
  0x3d   : > { %987 = vmatprep.subr.bf16.mxu0 %v986_v8  ;;  %p1179_p10 = pnand %p1178_p6, %p1589_p9  ;;  %s1181_s7 = sshll.u32 %s1253_s22, 4  ;;  %s1182_s7 = int_to_ptr.vmem [resolvable:$false] %s1181_s7 }
  0x3e   : > { %s1183_s9 = scalar_lea.vmem %s1182_s7, 512  ;;  %p1184_p2 = scmp.lt.s32.totalorder %s1525_s17, %s1182_s7 }
  0x3f   : > { %p1180_p12 = pneg %p1179_p10  ;;  %p1185_p3 = scmp.lt.s32.totalorder %s1183_s9, %s1177_s11 }
  0x40   : > { %989 = vmatpush3.bf16.msra.mxu0 %v986_v8 }
  0x41   : > { %991 = vmatprep.subr.bf16.mxu0 %v990_v12  ;;  %p1186_p4 = por %p1185_p3, %p1184_p2 }
  0x43   : > { %p1187_p7 = pnand %p1186_p4, %p1180_p12 }
  0x44   : > { %993 = vmatpush3.bf16.msra.mxu0 %v990_v12 }
  0x45   : > { %995 = vmatprep.subr.bf16.mxu0 %v994_v15 }
  0x48   : > { %997 = vmatpush3.bf16.msra.mxu0 %v994_v15 }
  0x49   : > { %999 = vmatprep.subr.bf16.mxu0 %v998_v18 }
  0x4c   : > { %1001 = vmatpush3.bf16.msra.mxu0 %v998_v18 }
  0x4d   : > { %1003 = vmatprep.subr.bf16.mxu0 %v1002_v21 }
  0x50   : > { %1005 = vmatpush3.bf16.msra.mxu0 %v1002_v21 }
  0x51   : > { %1007 = vmatprep.subr.bf16.mxu0 %v1006_v24 }
  0x54   : > { %1009 = vmatpush3.bf16.msra.mxu0 %v1006_v24 }
  0x55   : > { %973 = vmatprep.subr.msk.mxu0 %vm584_vm1, %v456_v43 }
  0x57   : > { %971 = vmatmul.mubr.f32.vlgmr.msra.gmra.mrb[0].mxu0 %v1428_v25 }
  0x58   : > { %974 = vmatpush3.msk.msra.mxu0 %vm584_vm1, %v456_v43  ;;  %v1248_v43 = vmov 0.0  }
  0x59   : > { %553 = vmatprep.mubr.f32.mxu1 %v1248_v43 }
 0x12a   : > { %v972_v27 = vpop.f32.mrb[0].mxu0 }
 0x12b   : > { %v332_v28 = vpop.f32.mrb[1].mxu0  ;;  %v338_v30 = vadd.f32 %v972_v27, %v907_v26 }
 0x12c   : > { %v333_v29 = vadd.f32 %v907_v26, %v332_v28 }
 0x12d   : > { %v345_v32 = vsel %vm341_vm0, %v338_v30, -inf }
 0x12e   : > { %v342_v31 = vsel %vm341_vm0, %v333_v29, -inf }
 0x12f   : > { %343 = vmax.xlane.f32.xlu0 %v342_v31 }
 0x133   : > { %346 = vmax.xlane.f32.xlu0 %v345_v32 }
 0x1bc   : > { %v344_v33 = vpop.xlane.xlu0 %343 }
 0x1bd   : > { %v348_v34 = vsub.f32 %v333_v29, %v344_v33 }
 0x1bf   : > { %v350_v35 = vmul.f32 1.442695, %v348_v34 }
 0x1c0   : > { %v347_v36 = vpop.xlane.xlu0 %346 }
 0x1c1   : > { %1141 = vpow2.f32 %v350_v35  ;;  %v349_v37 = vsub.f32 %v338_v30, %v347_v36  ;;  %v458_v36 = vld [vmem:[#allocation2 + $0x8] sm:$0xff] }
 0x1c3   : > { %v352_v38 = vmul.f32 1.442695, %v349_v37  ;;  %v460_v37 = vld [vmem:[#allocation2 + $0x28] sm:$0xff] }
 0x1c5   : > { %1143 = vpow2.f32 %v352_v38  ;;  %v457_v38 = vld [vmem:[#allocation2] sm:$0xff] }
 0x1cb   : > { %v1142_v39 = vpop.eup %1141 }
 0x1cc   : > { %v354_v40 = vsel %vm341_vm0, %v1142_v39, 0.0 }
 0x1cd   : > { %355 = vadd.xlane.f32.xlu1 %v354_v40  ;;  %v459_v40 = vld [vmem:[#allocation2 + $0x20] sm:$0xff] }
 0x1cf   : > { %v1144_v41 = vpop.eup %1143 }
 0x1d0   : > { %v357_v42 = vsel %vm341_vm0, %v1144_v41, 0.0 }
 0x1d1   : > { %358 = vadd.xlane.f32.xlu1 %v357_v42  ;;  %v464_v42 = vld [vmem:[#allocation2 + $0x68] sm:$0xff] }
 0x25a   : > { %v356_v44 = vpop.xlane.xlu1 %355 }
 0x25b   : > { %1145 = vrcp.f32 %v356_v44  ;;  %v1012_v44 = vpack.c.bf16 %v459_v40, %v457_v38  ;;  %v677_v38 = vld [vmem:[#allocation2 + $0x30] sm:$0xff]  ;;  %v682_v40 = vld [vmem:[#allocation2 + $0x78] sm:$0xff] }
 0x25e   : > { %v359_v45 = vpop.xlane.xlu1 %358 }
 0x25f   : > { %1147 = vrcp.f32 %v359_v45 }
 0x265   : > { %v1146_v46 = vpop.eup %1145 }
 0x266   : > { %v1441_v47 = vmul.f32 %v1146_v46, %v1142_v39  ;;  %v1010_v39 = vpack.c.bf16 %v460_v37, %v458_v36  ;;  %v461_v46 = vld [vmem:[#allocation2 + $0x40] sm:$0xff]  ;;  %v675_v37 = vld [vmem:[#allocation2 + $0x10] sm:$0xff] }
 0x268   : > { %975 = vmatprep.mubr.msk.f32.mxu0 %vm341_vm0, %v1441_v47  ;;  %v366_v48 = vsel %vm341_vm0, %v1441_v47, -inf  ;;  %1011 = vmatprep.subr.bf16.mxu1 %v1010_v39  ;;  %v680_v39 = vld [vmem:[#allocation2 + $0x58] sm:$0xff] }
 0x269   : > { %v1148_v49 = vpop.eup %1147  ;;  %367 = vmax.xlane.f32.xlu0 %v366_v48  ;;  %v463_v48 = vld [vmem:[#allocation2 + $0x60] sm:$0xff]  ;;  %1013 = vmatpush1.bf16.msra.mxu1 %v1012_v44  ;;  %v679_v44 = vld [vmem:[#allocation2 + $0x50] sm:$0xff] }
 0x26a   : > { %v1447_v50 = vmul.f32 %v1148_v49, %v1144_v41  ;;  %v462_v41 = vld [vmem:[#allocation2 + $0x48] sm:$0xff]  ;;  %v1016_v52 = vpack.c.bf16 %v463_v48, %v461_v46  ;;  %v684_v46 = vld [vmem:[#allocation2 + $0x98] sm:$0xff] }
 0x26b   : > { %v1014_v45 = vpack.c.bf16 %v464_v42, %v462_v41  ;;  %v466_v49 = vld [vmem:[#allocation2 + $0x88] sm:$0xff]  ;;  %v1044_v41 = vpack.c.bf16 %v677_v38, %v675_v37  ;;  %v1046_v42 = vpack.c.bf16 %v682_v40, %v680_v39  ;;  %v686_v48 = vld [vmem:[#allocation2 + $0xb8] sm:$0xff] }
 0x26c   : > { %976 = vmatmul.mubr.msk.f32.vlgmr.msra.gmra.mrb[2].mxu0 %vm341_vm0, %v1447_v50  ;;  %v369_v51 = vsel %vm341_vm0, %v1447_v50, -inf }
 0x26d   : > { %370 = vmax.xlane.f32.xlu1 %v369_v51  ;;  %v468_v51 = vld [vmem:[#allocation2 + $0xa8] sm:$0xff]  ;;  %1015 = vmatprep.subr.bf16.mxu1 %v1014_v45  ;;  %v681_v45 = vld [vmem:[#allocation2 + $0x70] sm:$0xff] }
 0x26e   : > { %1017 = vmatpush1.bf16.msra.mxu1 %v1016_v52  ;;  %v683_v52 = vld [vmem:[#allocation2 + $0x90] sm:$0xff] }
 0x2f6   : > { %v368_v54 = vpop.xlane.xlu0 %367 }
 0x2f7   : > { %vm372_vm2 = vcmp.eq.f32.partialorder %v1441_v47, %v368_v54  ;;  %v1018_v54 = vpack.c.bf16 %v468_v51, %v466_v49  ;;  %v1048_v49 = vpack.c.bf16 %v681_v45, %v679_v44  ;;  %v1050_v51 = vpack.c.bf16 %v686_v48, %v684_v46 }
 0x2f8   : > { %v374_v55 = vsel %vm372_vm2, %v1453_v53, 4 }
 0x2f9   : > { %v376_v56 = vsel %vm341_vm0, %v374_v55, 2147483647  ;;  %v465_v55 = vld [vmem:[#allocation2 + $0x80] sm:$0xff]  ;;  %1019 = vmatprep.subr.bf16.mxu1 %v1018_v54  ;;  %v685_v54 = vld [vmem:[#allocation2 + $0xb0] sm:$0xff] }
 0x2fa   : > { %v371_v57 = vpop.xlane.xlu1 %370  ;;  %v378_v58 = vshra.s32 %v376_v56, 16  ;;  %v377_v2 = vand.u32 65535, %v376_v56  ;;  %v467_v56 = vld [vmem:[#allocation2 + $0xa0] sm:$0xff] }
 0x2fb   : > { %vm373_vm3 = vcmp.eq.f32.partialorder %v1447_v50, %v371_v57  ;;  %v470_v57 = vld [vmem:[#allocation2 + $0xc8] sm:$0xff] }
 0x2fc   : > { %v375_v59 = vsel %vm373_vm3, %v1453_v53, 4  ;;  %v380_v60 = vcvt.s32.f32 %v378_v58  ;;  %v379_v4 = vcvt.s32.f32 %v377_v2  ;;  %v472_v58 = vld [vmem:[#allocation2 + $0xe8] sm:$0xff] }
 0x2fd   : > { %v391_v61 = vsel %vm341_vm0, %v375_v59, 2147483647  ;;  %v1020_v59 = vpack.c.bf16 %v467_v56, %v465_v55  ;;  %v476_v2 = vld [vmem:[#allocation2 + $0x128] sm:$0xff]  ;;  %v688_v55 = vld [vmem:[#allocation2 + $0xd8] sm:$0xff] }
 0x2fe   : > { %381 = vmin.xlane.f32.xlu0 %v380_v60  ;;  %v393_v62 = vshra.s32 %v391_v61, 16  ;;  %v392_v5 = vand.u32 65535, %v391_v61  ;;  %v469_v61 = vld [vmem:[#allocation2 + $0xc0] sm:$0xff]  ;;  %v690_v56 = vld [vmem:[#allocation2 + $0xf8] sm:$0xff] }
 0x2ff   : > { %1021 = vmatpush1.bf16.msra.mxu1 %v1020_v59  ;;  %v687_v59 = vld [vmem:[#allocation2 + $0xd0] sm:$0xff] }
 0x300   : > { %v395_v63 = vcvt.s32.f32 %v393_v62  ;;  %v394_v8 = vcvt.s32.f32 %v392_v5  ;;  %v471_v62 = vld [vmem:[#allocation2 + $0xe0] sm:$0xff] }
 0x301   : > { %v473_v5 = vld [vmem:[#allocation2 + $0x100] sm:$0xff] }
 0x302   : > { %396 = vmin.xlane.f32.xlu1 %v395_v63 }
 0x33f   : > { %v1461_v0 = vpop.f32.mrb[2].mxu0 }
 0x340   : > { %v1463_v1 = vpop.f32.mrb[3].mxu0 }
 0x38b   : > { %v382_v3 = vpop.xlane.xlu0 %381 }
 0x38c   : > { %vm383_vm4 = vcmp.eq.f32.partialorder %v380_v60, %v382_v3  ;;  %v388_v11 = vcvt.f32.s32 %v382_v3  ;;  %v1022_v60 = vpack.c.bf16 %v472_v58, %v470_v57  ;;  %v1024_v3 = vpack.c.bf16 %v471_v62, %v469_v61  ;;  %v692_v61 = vld [vmem:[#allocation2 + $0x118] sm:$0xff] }
 0x38d   : > { %v384_v6 = vsel %vm383_vm4, %v379_v4, inf  ;;  %v1052_v57 = vpack.c.bf16 %v685_v54, %v683_v52  ;;  %v1054_v58 = vpack.c.bf16 %v690_v56, %v688_v55  ;;  %v694_v62 = vld [vmem:[#allocation2 + $0x138] sm:$0xff]  ;;  %v1250_v52 = vmov 3  }
 0x38e   : > { %385 = vmin.xlane.f32.xlu0 %v384_v6  ;;  %v389_v13 = vshll.u32 %v388_v11, 16  ;;  %1023 = vmatprep.subr.bf16.mxu1 %v1022_v60  ;;  %v475_v6 = vld [vmem:[#allocation2 + $0x120] sm:$0xff]  ;;  %v689_v60 = vld [vmem:[#allocation2 + $0xf0] sm:$0xff]  ;;  %v1251_v55 = vmov 1  }
 0x38f   : > { %v397_v7 = vpop.xlane.xlu1 %396  ;;  %1025 = vmatpush1.bf16.msra.mxu1 %v1024_v3  ;;  %v691_v3 = vld [vmem:[#allocation2 + $0x110] sm:$0xff] }
 0x390   : > { %vm398_vm5 = vcmp.eq.f32.partialorder %v395_v63, %v397_v7  ;;  %v403_v14 = vcvt.f32.s32 %v397_v7  ;;  %v474_v63 = vld [vmem:[#allocation2 + $0x108] sm:$0xff] }
 0x391   : > { %v399_v10 = vsel %vm398_vm5, %v394_v8, inf  ;;  %v1026_v4 = vpack.c.bf16 %v476_v2, %v474_v63  ;;  %v478_v7 = vld [vmem:[#allocation2 + $0x148] sm:$0xff]  ;;  %v1056_v63 = vpack.c.bf16 %v689_v60, %v687_v59  ;;  %v1058_v2 = vpack.c.bf16 %v694_v62, %v692_v61 }
 0x392   : > { %400 = vmin.xlane.f32.xlu1 %v399_v10  ;;  %v404_v18 = vshll.u32 %v403_v14, 16  ;;  %v480_v8 = vld [vmem:[#allocation2 + $0x168] sm:$0xff]  ;;  %v1028_v10 = vpack.c.bf16 %v475_v6, %v473_v5  ;;  %v696_v5 = vld [vmem:[#allocation2 + $0x158] sm:$0xff] }
 0x393   : > { %1027 = vmatprep.subr.bf16.mxu1 %v1026_v4  ;;  %v1030_v11 = vpack.c.bf16 %v480_v8, %v478_v7  ;;  %v482_v14 = vld [vmem:[#allocation2 + $0x188] sm:$0xff]  ;;  %v693_v4 = vld [vmem:[#allocation2 + $0x130] sm:$0xff]  ;;  %v698_v6 = vld [vmem:[#allocation2 + $0x178] sm:$0xff] }
 0x394   : > { %1029 = vmatpush1.bf16.msra.mxu1 %v1028_v10  ;;  %v1060_v7 = vpack.c.bf16 %v693_v4, %v691_v3  ;;  %v1062_v8 = vpack.c.bf16 %v698_v6, %v696_v5  ;;  %v695_v10 = vld [vmem:[#allocation2 + $0x150] sm:$0xff] }
 0x395   : > { %1031 = vmatprep.subr.bf16.mxu1 %v1030_v11  ;;  %v697_v11 = vld [vmem:[#allocation2 + $0x170] sm:$0xff] }
 0x41b   : > { %v386_v12 = vpop.xlane.xlu0 %385 }
 0x41c   : > { %v387_v15 = vcvt.f32.s32 %v386_v12  ;;  %v477_v12 = vld [vmem:[#allocation2 + $0x140] sm:$0xff] }
 0x41e   : > { %v1465_v16 = vadd.s32 %v389_v13, %v387_v15  ;;  %v479_v13 = vld [vmem:[#allocation2 + $0x160] sm:$0xff]  ;;  %v484_v15 = vld [vmem:[#allocation2 + $0x1a8] sm:$0xff] }
 0x41f   : > { %v401_v17 = vpop.xlane.xlu1 %400 }
 0x420   : > { %v402_v19 = vcvt.f32.s32 %v401_v17  ;;  %vm406_vm6 = vcmp.eq.s32.totalorder %v1453_v53, %v1465_v16  ;;  %v1032_v17 = vpack.c.bf16 %v479_v13, %v477_v12  ;;  %v700_v12 = vld [vmem:[#allocation2 + $0x198] sm:$0xff] }
 0x421   : > { %v408_v20 = vsel %vm406_vm6, -inf, %v1441_v47  ;;  %v702_v13 = vld [vmem:[#allocation2 + $0x1b8] sm:$0xff] }
 0x422   : > { %v1473_v21 = vadd.s32 %v404_v18, %v402_v19  ;;  %v410_v22 = vsel %vm341_vm0, %v408_v20, -inf  ;;  %v1034_v18 = vpack.c.bf16 %v484_v15, %v482_v14  ;;  %v481_v19 = vld [vmem:[#allocation2 + $0x180] sm:$0xff]  ;;  %1033 = vmatpush1.bf16.msra.mxu1 %v1032_v17  ;;  %v1064_v14 = vpack.c.bf16 %v697_v11, %v695_v10  ;;  %v699_v17 = vld [vmem:[#allocation2 + $0x190] sm:$0xff] }
 0x423   : > { %411 = vmax.xlane.f32.xlu0 %v410_v22  ;;  %v486_v22 = vld [vmem:[#allocation2 + $0x1c8] sm:$0xff]  ;;  %v1066_v15 = vpack.c.bf16 %v702_v13, %v700_v12 }
 0x424   : > { %vm407_vm7 = vcmp.eq.s32.totalorder %v1453_v53, %v1473_v21  ;;  %1035 = vmatprep.subr.bf16.mxu1 %v1034_v18  ;;  %v701_v18 = vld [vmem:[#allocation2 + $0x1b0] sm:$0xff] }
 0x425   : > { %v409_v23 = vsel %vm407_vm7, -inf, %v1447_v50 }
 0x426   : > { %v413_v24 = vsel %vm341_vm0, %v409_v23, -inf }
 0x427   : > { %414 = vmax.xlane.f32.xlu1 %v413_v24 }
 0x4b0   : > { %v412_v26 = vpop.xlane.xlu0 %411 }
 0x4b1   : > { %vm416_vm8 = vcmp.eq.f32.partialorder %v408_v20, %v412_v26  ;;  %v483_v20 = vld [vmem:[#allocation2 + $0x1a0] sm:$0xff] }
 0x4b2   : > { %v418_v27 = vsel %vm416_vm8, %v1453_v53, 4  ;;  %v1036_v24 = vpack.c.bf16 %v483_v20, %v481_v19  ;;  %v704_v19 = vld [vmem:[#allocation2 + $0x1d8] sm:$0xff] }
 0x4b3   : > { %v1485_v28 = vsel %vm341_vm0, %v418_v27, 2147483647  ;;  %v485_v27 = vld [vmem:[#allocation2 + $0x1c0] sm:$0xff]  ;;  %v706_v20 = vld [vmem:[#allocation2 + $0x1f8] sm:$0xff] }
 0x4b4   : > { %v415_v29 = vpop.xlane.xlu1 %414  ;;  %v422_v30 = vshra.s32 %v1485_v28, 16  ;;  %1037 = vmatpush1.bf16.msra.mxu1 %v1036_v24  ;;  %v703_v24 = vld [vmem:[#allocation2 + $0x1d0] sm:$0xff] }
 0x4b5   : > { %vm417_vm9 = vcmp.eq.f32.partialorder %v409_v23, %v415_v29  ;;  %v488_v23 = vld [vmem:[#allocation2 + $0x1e8] sm:$0xff]  ;;  %v487_v29 = vld [vmem:[#allocation2 + $0x1e0] sm:$0xff] }
 0x4b6   : > { %v419_v31 = vsel %vm417_vm9, %v1453_v53, 4  ;;  %v1489_v32 = vcvt.s32.f32 %v422_v30  ;;  %v1038_v26 = vpack.c.bf16 %v488_v23, %v486_v22  ;;  %v676_v30 = vld [vmem:[#allocation2 + $0x18] sm:$0xff]  ;;  %v1068_v22 = vpack.c.bf16 %v701_v18, %v699_v17 }
 0x4b7   : > { %v1492_v33 = vsel %vm341_vm0, %v419_v31, 2147483647  ;;  %v678_v31 = vld [vmem:[#allocation2 + $0x38] sm:$0xff]  ;;  %v1070_v23 = vpack.c.bf16 %v706_v20, %v704_v19 }
 0x4b8   : > { %425 = vmin.xlane.f32.xlu0 %v1489_v32  ;;  %v437_v34 = vshra.s32 %v1492_v33, 16  ;;  %1039 = vmatprep.subr.bf16.mxu1 %v1038_v26  ;;  %v1042_v36 = vpack.c.bf16 %v678_v31, %v676_v30  ;;  %v705_v26 = vld [vmem:[#allocation2 + $0x1f0] sm:$0xff] }
 0x4ba   : > { %v1496_v35 = vcvt.s32.f32 %v437_v34  ;;  %v1040_v34 = vpack.c.bf16 %v487_v29, %v485_v27  ;;  %v1072_v27 = vpack.c.bf16 %v705_v26, %v703_v24  ;;  %v421_v29 = vand.u32 65535, %v1485_v28 }
 0x4bc   : > { %440 = vmin.xlane.f32.xlu1 %v1496_v35  ;;  %1041 = vmatpush1.bf16.msra.mxu1 %v1040_v34  ;;  %v423_v31 = vcvt.s32.f32 %v421_v29  ;;  %v436_v34 = vand.u32 65535, %v1492_v33 }
 0x4bd   : > { %1043 = vmatprep.subr.bf16.mxu1 %v1042_v36 }
 0x4be   : > { %v438_v38 = vcvt.s32.f32 %v436_v34 }
 0x4bf   : > { %554 = vmatmul.mubr.f32.vlgmr.msra.gmra.mrb[0].mxu1 %v1394_v9 }
 0x4c0   : > { %1045 = vmatpush1.bf16.msra.mxu1 %v1044_v41  ;;  %559 = vmatprep.mubr.f32.mxu1 %v1248_v43 }
 0x4c1   : > { %1047 = vmatprep.subr.bf16.mxu1 %v1046_v42 }
 0x4c3   : > { %560 = vmatmul.mubr.f32.gmra.mrb[2].mxu1 %v1428_v25 }
 0x4c4   : > { %1049 = vmatpush1.bf16.msra.mxu1 %v1048_v49  ;;  %771 = vmatprep.mubr.f32.mxu1 %v1248_v43 }
 0x4c5   : > { %1051 = vmatprep.subr.bf16.mxu1 %v1050_v51 }
 0x4c8   : > { %1053 = vmatpush1.bf16.msra.mxu1 %v1052_v57 }
 0x4c9   : > { %1055 = vmatprep.subr.bf16.mxu1 %v1054_v58 }
 0x4cc   : > { %1057 = vmatpush1.bf16.msra.mxu1 %v1056_v63 }
 0x4cd   : > { %1059 = vmatprep.subr.bf16.mxu1 %v1058_v2 }
 0x4d0   : > { %1061 = vmatpush1.bf16.msra.mxu1 %v1060_v7 }
 0x4d1   : > { %1063 = vmatprep.subr.bf16.mxu1 %v1062_v8 }
 0x4d4   : > { %1065 = vmatpush1.bf16.msra.mxu1 %v1064_v14 }
 0x4d5   : > { %1067 = vmatprep.subr.bf16.mxu1 %v1066_v15 }
 0x4d8   : > { %1069 = vmatpush1.bf16.msra.mxu1 %v1068_v22 }
 0x4d9   : > { %1071 = vmatprep.subr.bf16.mxu1 %v1070_v23 }
 0x4dc   : > { %1073 = vmatpush1.bf16.msra.mxu1 %v1072_v27 }
 0x4df   : > { %772 = vmatmul.mubr.f32.vlgmr.msra.gmra.mrb[4].mxu1 %v1394_v9  ;;  %v1249_v9 = vmov 0  }
 0x4e0   : > { %777 = vmatprep.mubr.f32.mxu1 %v1248_v43  ;;  %1133 = vset.pattern.permute.xlu0 %v1249_v9 }
 0x4e1   : > { %1134 = vset.pattern.permute.xlu1 %v1249_v9 }
 0x4e3   : > { %778 = vmatmul.mubr.f32.gmra.mrb[6].mxu1 %v1428_v25 }
 0x545   : > { %v426_v30 = vpop.xlane.xlu0 %425 }
 0x546   : > { %vm427_vm10 = vcmp.eq.f32.partialorder %v1489_v32, %v426_v30  ;;  %v432_v28 = vcvt.f32.s32 %v426_v30 }
 0x547   : > { %v428_v36 = vsel %vm427_vm10, %v423_v31, inf }
 0x548   : > { %429 = vmin.xlane.f32.xlu0 %v428_v36  ;;  %v433_v41 = vshll.u32 %v432_v28, 16 }
 0x549   : > { %v441_v37 = vpop.xlane.xlu1 %440 }
 0x54a   : > { %vm442_vm11 = vcmp.eq.f32.partialorder %v1496_v35, %v441_v37  ;;  %v447_v42 = vcvt.f32.s32 %v441_v37 }
 0x54b   : > { %v443_v39 = vsel %vm442_vm11, %v438_v38, inf }
 0x54c   : > { %444 = vmin.xlane.f32.xlu1 %v443_v39  ;;  %v448_v45 = vshll.u32 %v447_v42, 16 }
 0x592   : > { %v555_v25 = vpop.f32.mrb[0].mxu1 }
 0x593   : > { %v557_v43 = vpop.f32.mrb[1].mxu1 }
 0x596   : > { %v561_v49 = vpop.f32.mrb[2].mxu1 }
 0x597   : > { %v563_v54 = vpop.f32.mrb[3].mxu1 }
 0x5b2   : > { %v773_v16 = vpop.f32.mrb[4].mxu1 }
 0x5b3   : > { %v775_v56 = vpop.f32.mrb[5].mxu1 }
 0x5b6   : > { %v779_v57 = vpop.f32.mrb[6].mxu1 }
 0x5d5   : > { %v430_v40 = vpop.xlane.xlu0 %429 }
 0x5d6   : > { %v431_v33 = vcvt.f32.s32 %v430_v40 }
 0x5d8   : > { %v434_v44 = vadd.s32 %v433_v41, %v431_v33 }
 0x5d9   : > { %v445_v32 = vpop.xlane.xlu1 %444 }
 0x5da   : > { %vm450_vm12 = vcmp.eq.s32.totalorder %v1453_v53, %v434_v44  ;;  %v446_v46 = vcvt.f32.s32 %v445_v32 }
 0x5db   : > { %vm452_vm13 = vmor %vm406_vm6, %vm450_vm12 }
 0x5dc   : > { %v449_v35 = vadd.s32 %v448_v45, %v446_v46  ;;  %v454_v48 = vsel %vm452_vm13, %v1441_v47, 0.0  ;;  %v1252_v47 = vmov 2  }
 0x5dd   : > { %568 = vperm.xlu0 %1133, %v454_v48  }
 0x5de   : > { %vm451_vm14 = vcmp.eq.s32.totalorder %v1453_v53, %v449_v35 }
 0x5df   : > { %vm453_vm15 = vmor %vm407_vm7, %vm451_vm14 }
 0x5e0   : > { %v455_v51 = vsel %vm453_vm15, %v1447_v50, 0.0  ;;  %v781_v50 = vpop.f32.mrb[7].mxu1 }
 0x5e1   : > { %573 = vperm.xlu1 %1134, %v455_v51   ;;  %1140 = vset.pattern.permute.xlu0 %v1250_v52 }
 0x5e5   : > { %1135 = vset.pattern.permute.xlu1 %v1251_v55 }
 0x5e6   : > { %668 = vperm.xlu1 %1135, %v455_v51  }
 0x5ea   : > { %1136 = vset.pattern.permute.xlu1 %v1252_v47 }
 0x5eb   : > { %789 = vperm.xlu1 %1136, %v455_v51  }
 0x5ef   : > { %1137 = vset.pattern.permute.xlu1 %v1251_v55 }
 0x5f0   : > { %664 = vperm.xlu1 %1137, %v454_v48  }
 0x5f4   : > { %1138 = vset.pattern.permute.xlu1 %v1252_v47 }
 0x5f5   : > { %785 = vperm.xlu1 %1138, %v454_v48  }
 0x5f9   : > { %1139 = vset.pattern.permute.xlu1 %v1250_v52 }
 0x5fa   : > { %797 = vperm.xlu1 %1139, %v454_v48  }
 0x5fe   : > { %801 = vperm.xlu1 %1139, %v455_v51  }
 0x65c   : > { %v569_v53 = vpop.permute.xlu0 %568 }
 0x65d   : > { %v576_v21 = vmul.f32 %v569_v53, %v555_v25 }
 0x65f   : > { %v655_v58 = vadd.f32 %v1463_v1, %v576_v21 }
 0x660   : > { %v574_v59 = vpop.permute.xlu1 %573 }
 0x661   : > { %v577_v60 = vmul.f32 %v574_v59, %v561_v49 }
 0x663   : > { %v660_v61 = vadd.f32 %v1461_v0, %v577_v60 }
 0x665   : > { %v669_v62 = vpop.permute.xlu1 %668 }
 0x666   : > { %v672_v63 = vmul.f32 %v669_v62, %v563_v54 }
 0x668   : > { %v674_v2 = vadd.f32 %v672_v63, %v660_v61 }
 0x66a   : > { %v790_v3 = vpop.permute.xlu1 %789 }
 0x66b   : > { %v793_v4 = vmul.f32 %v790_v3, %v779_v57 }
 0x66d   : > { %v795_v5 = vadd.f32 %v793_v4, %v674_v2 }
 0x66f   : > { %v665_v6 = vpop.permute.xlu1 %664 }
 0x670   : > { %v671_v7 = vmul.f32 %v665_v6, %v557_v43 }
 0x672   : > { %v673_v8 = vadd.f32 %v671_v7, %v655_v58 }
 0x674   : > { %v786_v10 = vpop.permute.xlu1 %785 }
 0x675   : > { %v792_v11 = vmul.f32 %v786_v10, %v773_v16 }
 0x677   : > { %v794_v12 = vadd.f32 %v792_v11, %v673_v8 }
 0x679   : > { %v798_v1 = vpop.permute.xlu1 %797 }
 0x67a   : > { %v804_v13 = vmul.f32 %v798_v1, %v775_v56 }
 0x67c   : > { %v806_v0 = vadd.f32 %v804_v13, %v794_v12 }
 0x67d   : > { %v802_v14 = vpop.permute.xlu1 %801 }
 0x67e   : > { %808 = vst [vmem:[%s233_s16] sm:$0xff] %v806_v0  ;;  %v805_v15 = vmul.f32 %v802_v14, %v781_v50 }
 0x680   : > { %v807_v17 = vadd.f32 %v805_v15, %v795_v5 }
 0x682   : > { %809 = vst [vmem:[%s233_s16 + $0x8] sm:$0xff] %v807_v17 }
 0x683   : > { %1190 = shalt.err (!%p1187_p7)
}
 0x684   : > { %s1191_s30 = scalar_lea.hbm %s1530_s10, 256  ;;  %s1195_s13 = scalar_lea.hbm %s1578_s5, 512 }
 0x685   : > { %p1192_p8 = scmp.ne.s32.totalorder %s1530_s10, %s1191_s30  ;;  %p1196_p1 = scmp.lt.u32.totalorder %s1530_s10, %s1578_s5 }
 0x686   : > { %p1197_p0 = scmp.lt.u32.totalorder %s1195_s13, %s1191_s30  ;;  %p1199_p6 = scmp.lt.u32.totalorder %s1191_s30, %s1530_s10 }
 0x687   : > { %p1193_p11 = pnand %p1192_p8, %p1589_p9 }
 0x688   : > { %p1198_p5 = por %p1197_p0, %p1196_p1 }
 0x689   : > { %p1194_p13 = pneg %p1193_p11 }
 0x68a   : > { %p1200_p10 = por %p1199_p6, %p1198_p5 }
 0x68c   : > { %p1201_p12 = pnand %p1200_p10, %p1194_p13 }
 0x68e   : > { %1204 = shalt.err (!%p1201_p12)
}
 0x68f   : > { %s1254_s16 = smov 128   ;;  %s1255_s23 = smov 8  }
 0x690   : > { %1078 = dma.vmem_to_hbm [thread:$0]  (%p1589_p9), %s1525_s17, 256, %s1530_s10, %s1532_s8, %s1254_s16, %s1254_s16, %s1255_s23  }
 0x691 PF: > { %p1090_p2 = scmp.ge.s32.totalorder %s1243_s21, 2  ;;  %s839_s25 = sand.u32 1, %s1231_s18  }
 0x692   : > { %p1590_p3 = scmp.ne.s32.totalorder %s1583_s29, 0  ;;  %s840_s26 = scalar_lea.sflag [#allocation4], %s839_s25 }
 0x694   : > { %p1085_p4 = pnand %p1090_p2, %p1590_p3 }
 0x696   : > { %1226 = dma.done.wait (!%p1085_p4), %s840_s26, 256  }
 0x697   : > { %1228 = vsyncadd (!%p1085_p4), %s840_s26, 4294967040  ;;  %p16_p7 = scmp.ge.s32.totalorder %s1311_s24, 4   ;;  %s1591_s18 = smov %s1235_s19 }
 0x698   : > { %s1592_s19 = smov %s1239_s20  ;;  %s1593_s20 = smov %s1322_s27 }
 0x699   : > { %s1594_s21 = smov %s1311_s24  ;;  %18 = sbr.rel (!%p16_p7) target bundleno = 4 (0x4), region = 80 }
 0x6a0   :  { %845 = vsyncpa [#allocation3], 1 }
 0x6a1   :  { %847 = vsyncpa [#allocation3 + $0x1], 1 }
 0x6a2   :  { %848 = vsyncpa [#allocation4], 1 }
 0x6a3   :  { %850 = vsyncpa [#allocation4 + $0x1], 1 }

// kernel: tpu_custom_call.1
= control target key start
LH: loop header
LB: loop body
LE: loop exit
PB: predicated region body
PF: predicated region fallthrough
CT: control target
= control target key end

     0   :  { %10 = vsyncpa [#allocation3], 0  ;;  %s1573_s0 = inlined_call_operand.vmem [shape: f32[32,128], index: 0, kind: input, shape index: {}]   ;;  %s1574_s1 = inlined_call_operand.vmem [shape: f32[128,4], index: 1, kind: input, shape index: {}]   ;;  %s1575_s2 = inlined_call_operand.vmem [shape: f32[1,4], index: 2, kind: input, shape index: {}]   ;;  %s1576_s3 = inlined_call_operand.hbm [shape: f32[128,512], index: 3, kind: input, shape index: {}]   ;;  %s1577_s4 = inlined_call_operand.vmem [shape: f32[4,128], index: 4, kind: input, shape index: {}]   ;;  %s1578_s5 = inlined_call_operand.hbm [shape: f32[32,128], index: 5, kind: output, shape index: {}]  }
   0x1   :  { %11 = vsyncpa [#allocation4], 0 }
   0x2   :  { %13 = vsyncpa [#allocation4 + $0x1], 0  ;;  %s1286_s18 = smov 0   ;;  %s1288_s19 = smov 0  }
   0x3   :  { %s1290_s20 = smov 0   ;;  %s1292_s21 = smov 0  }
   0x4 LB: > { %s1307_s22 = sadd.s32 4294967295, %s1243_s21   ;;  %s898_s23 = sadd.s32 4294967294, %s1243_s21   ;;  %s1243_s21 = sphi %s1292_s21, %s1594_s21   ;;  %s1239_s20 = sphi %s1290_s20, %s1593_s20   ;;  %s1235_s19 = sphi %s1288_s19, %s1592_s19   ;;  %s1231_s18 = sphi %s1286_s18, %s1591_s18  }
   0x5   : > { %s1311_s24 = sadd.s32 1, %s1243_s21   ;;  %s136_s25 = sadd.s32 1, %s1239_s20 }
   0x6   : > { %s133_s26 = ssub.s32 %s1243_s21, %s1311_s24  ;;  %p146_p0 = scmp.ne.s32.totalorder %s1239_s20, %s1235_s19 }
   0x7   : > { %p134_p1 = scmp.eq.s32.totalorder %s133_s26, 0  ;;  %p147_p2 = scmp.eq.s32.totalorder %s1307_s22, 1 }
   0x8   : > { %p152_p3 = scmp.ne.s32.totalorder %s1235_s19, %s1231_s18  ;;  %p153_p4 = scmp.eq.s32.totalorder %s898_s23, 1 }
   0x9   : > { %s1322_s27 = scalar_select %p134_p1, %s1239_s20, %s136_s25  }
   0xa   : > { %p1324_p5 = por %p147_p2, %p146_p0  ;;  %p1328_p6 = por %p153_p4, %p152_p3 }
   0xb   : > { %p899_p7 = scmp.ge.s32.totalorder %s1243_s21, 1  ;;  %p160_p8 = scmp.lt.s32.totalorder %s1243_s21, 3 }
   0xc   : > { %s1582_s28 = scalar_select %p1324_p5, 1, 0 }
   0xd   : > { %s1583_s29 = scalar_select %p1328_p6, 1, 0 }
   0xe   : > { %p1579_p9 = scmp.eq.s32.totalorder %s1307_s22, 0  ;;  %p1335_p10 = pnand %p899_p7, %p160_p8 }
   0xf   : > { %s1245_s6 = smov [#allocation2]   ;;  %s1149_s11 = scalar_lea.hbm %s1576_s3, 8192 }
  0x10   : > { %s1584_s30 = scalar_select %p1335_p10, 1, 0 }
  0x11   : > { %s178_s7 = sshll.u32 %s1245_s6, 4  ;;  %p1080_p11 = pneg %p1335_p10  ;;  %s179_s7 = int_to_ptr.vmem [resolvable:$true] %s178_s7 }
  0x12   : > { %p1150_p13 = scmp.ne.s32.totalorder %s1576_s3, %s1149_s11  ;;  %p1156_p3 = scmp.lt.u32.totalorder %s1149_s11, %s1576_s3 }
  0x13   : > { %p1343_p12 = pnand %p1579_p9, %p1080_p11 }
  0x15   : > { %p1151_p0 = pneg %p1343_p12 }
  0x17   : > { %p1152_p1 = pnand %p1151_p0, %p1150_p13 }
  0x19   : > { %p1153_p2 = pneg %p1152_p1 }
  0x1b   : > { %p1158_p4 = pnand %p1156_p3, %p1153_p2 }
  0x1d   : > { %1161 = shalt.err (!%p1158_p4)
}
  0x1e   : > { %s1162_s16 = scalar_lea.vmem %s179_s7, 8192  ;;  %p1170_p9 = scmp.lt.s32.totalorder %s179_s7, %s179_s7 }
  0x1f   : > { %p1163_p7 = scmp.ne.s32.totalorder %s179_s7, %s1162_s16  ;;  %p1171_p6 = scmp.lt.s32.totalorder %s1162_s16, %s1162_s16 }
  0x21   : > { %p1165_p8 = pnand %p1163_p7, %p1151_p0  ;;  %p1172_p5 = por %p1171_p6, %p1170_p9 }
  0x23   : > { %p1166_p11 = pneg %p1165_p8 }
  0x25   : > { %p1173_p10 = pnand %p1172_p5, %p1166_p11 }
  0x27   : > { %1176 = shalt.err (!%p1173_p10)
}
  0x28   : > { %s1246_s17 = smov 512   ;;  %s1247_s23 = smov 32  }
  0x29   : > { %1083 = dma.hbm_to_vmem [thread:$0]  (!%p1343_p12), %s1576_s3, 8192, %s179_s7, [#allocation3], %s1246_s17, %s1246_s17, %s1247_s23  }
  0x2a   : > { %p1586_p13 = scmp.ne.s32.totalorder %s1584_s30, 0 }
  0x2b   : > { %p1587_p1 = scmp.eq.s32.totalorder (!%p1586_p13), %s1307_s22, 0 }
  0x2c   : > { %206 = sbr.rel (%p1586_p13) target bundleno = 1681 (0x691), region = 40 }
  0x33   : > { %1222 = dma.done.wait (%p1587_p1), [#allocation3], 8192   ;;  %p1588_p0 = pmov %p1587_p1 }
  0x34   : > { %s905_s6 = sshll.u32 %s1307_s22, 1  ;;  %v243_v0 = vld [vmem:[%s1574_s1] sm:$0xff]  ;;  %v244_v1 = vld [vmem:[%s1574_s1 + $0x8] sm:$0xff]  ;;  %v245_v2 = vld [vmem:[%s1574_s1 + $0x10] sm:$0xff]  ;;  %vm341_vm0 = vcmask 31744   ;;  %vm584_vm1 = vcmask 1043456   ;;  %v364_v52 = vlaneseq }
  0x35   : > { %1224 = vsyncadd (%p1588_p0), [#allocation3], 4294959104  ;;  %p235_p5 = scmp.lt.s32.totalorder %s905_s6, 3  ;;  %v978_v3 = vpack.c.bf16 %v244_v1, %v243_v0  ;;  %v246_v4 = vld [vmem:[%s1574_s1 + $0x18] sm:$0xff]  ;;  %v247_v6 = vld [vmem:[%s1574_s1 + $0x20] sm:$0xff]  ;;  %s231_s14 = sand.u32 1, %s1235_s19  }
  0x36   : > { %v982_v5 = vpack.c.bf16 %v246_v4, %v245_v2  ;;  %v248_v7 = vld [vmem:[%s1574_s1 + $0x28] sm:$0xff]  ;;  %v249_v10 = vld [vmem:[%s1574_s1 + $0x30] sm:$0xff]  ;;  %v250_v11 = vld [vmem:[%s1574_s1 + $0x38] sm:$0xff]  ;;  %v1453_v53 = vand.u32 127, %v364_v52  ;;  %s904_s15 = sshll.u32 %s231_s14, 4  ;;  %s916_s23 = sshll.u32 %s1307_s22, 8 }
  0x37   : > { %s1596_s6 = smov (!%p235_p5, %s905_s6), 3  ;;  %979 = vmatprep.subr.bf16.mxu0 %v978_v3  ;;  %v986_v8 = vpack.c.bf16 %v248_v7, %v247_v6  ;;  %v990_v12 = vpack.c.bf16 %v250_v11, %v249_v10  ;;  %v251_v13 = vld [vmem:[%s1574_s1 + $0x40] sm:$0xff]  ;;  %v252_v14 = vld [vmem:[%s1574_s1 + $0x48] sm:$0xff]  ;;  %v253_v16 = vld [vmem:[%s1574_s1 + $0x50] sm:$0xff]  ;;  %s233_s16 = scalar_lea.vmem [#allocation5], %s904_s15 }
  0x38   : > { %s906_s9 = sshll.u32 %s1596_s6, 3  ;;  %981 = vmatpush3.bf16.msra.mxu0 %v978_v3  ;;  %v994_v15 = vpack.c.bf16 %v252_v14, %v251_v13  ;;  %v254_v17 = vld [vmem:[%s1574_s1 + $0x58] sm:$0xff]  ;;  %v255_v19 = vld [vmem:[%s1574_s1 + $0x60] sm:$0xff]  ;;  %v256_v20 = vld [vmem:[%s1574_s1 + $0x68] sm:$0xff]  ;;  %s824_s17 = sshll.u32 %s233_s16, 4  ;;  %s1525_s17 = int_to_ptr.vmem [resolvable:$true] %s824_s17 }
  0x39   : > { %s1391_s6 = scalar_lea.vmem %s1573_s0, %s906_s9  ;;  %983 = vmatprep.subr.bf16.mxu0 %v982_v5  ;;  %v998_v18 = vpack.c.bf16 %v254_v17, %v253_v16  ;;  %v1002_v21 = vpack.c.bf16 %v256_v20, %v255_v19  ;;  %v257_v22 = vld [vmem:[%s1574_s1 + $0x70] sm:$0xff]  ;;  %v258_v23 = vld [vmem:[%s1574_s1 + $0x78] sm:$0xff]  ;;  %v907_v26 = vld [vmem:[%s1575_s2] ss:$0 sm:$0xff]  ;;  %s1530_s10 = scalar_lea.hbm %s1578_s5, %s916_s23 }
  0x3a   : > { %v1394_v9 = vld [vmem:[%s1391_s6] sm:$0xff]  ;;  %v1006_v24 = vpack.c.bf16 %v258_v23, %v257_v22  ;;  %v1428_v25 = vld [vmem:[%s1391_s6 + $0x8] sm:$0xff]  ;;  %s1532_s8 = scalar_lea.sflag [#allocation4], %s231_s14  ;;  %s1177_s11 = scalar_lea.vmem %s1525_s17, 256 }
  0x3b   : > { %970 = vmatprep.mubr.f32.mxu0 %v1394_v9  ;;  %v456_v43 = vld [vmem:[%s1577_s4] sm:$0xf]  ;;  %p1178_p6 = scmp.ne.s32.totalorder %s1525_s17, %s1177_s11  ;;  %p1589_p9 = scmp.ne.s32.totalorder %s1582_s28, 0 }
  0x3c   : > { %985 = vmatpush3.bf16.msra.mxu0 %v982_v5  ;;  %s1253_s22 = smov [#allocation5]  }
  0x3d   : > { %987 = vmatprep.subr.bf16.mxu0 %v986_v8  ;;  %p1179_p10 = pnand %p1178_p6, %p1589_p9  ;;  %s1181_s7 = sshll.u32 %s1253_s22, 4  ;;  %s1182_s7 = int_to_ptr.vmem [resolvable:$false] %s1181_s7 }
  0x3e   : > { %s1183_s9 = scalar_lea.vmem %s1182_s7, 512  ;;  %p1184_p2 = scmp.lt.s32.totalorder %s1525_s17, %s1182_s7 }
  0x3f   : > { %p1180_p12 = pneg %p1179_p10  ;;  %p1185_p3 = scmp.lt.s32.totalorder %s1183_s9, %s1177_s11 }
  0x40   : > { %989 = vmatpush3.bf16.msra.mxu0 %v986_v8 }
  0x41   : > { %991 = vmatprep.subr.bf16.mxu0 %v990_v12  ;;  %p1186_p4 = por %p1185_p3, %p1184_p2 }
  0x43   : > { %p1187_p7 = pnand %p1186_p4, %p1180_p12 }
  0x44   : > { %993 = vmatpush3.bf16.msra.mxu0 %v990_v12 }
  0x45   : > { %995 = vmatprep.subr.bf16.mxu0 %v994_v15 }
  0x48   : > { %997 = vmatpush3.bf16.msra.mxu0 %v994_v15 }
  0x49   : > { %999 = vmatprep.subr.bf16.mxu0 %v998_v18 }
  0x4c   : > { %1001 = vmatpush3.bf16.msra.mxu0 %v998_v18 }
  0x4d   : > { %1003 = vmatprep.subr.bf16.mxu0 %v1002_v21 }
  0x50   : > { %1005 = vmatpush3.bf16.msra.mxu0 %v1002_v21 }
  0x51   : > { %1007 = vmatprep.subr.bf16.mxu0 %v1006_v24 }
  0x54   : > { %1009 = vmatpush3.bf16.msra.mxu0 %v1006_v24 }
  0x55   : > { %973 = vmatprep.subr.msk.mxu0 %vm584_vm1, %v456_v43 }
  0x57   : > { %971 = vmatmul.mubr.f32.vlgmr.msra.gmra.mrb[0].mxu0 %v1428_v25 }
  0x58   : > { %974 = vmatpush3.msk.msra.mxu0 %vm584_vm1, %v456_v43  ;;  %v1248_v43 = vmov 0.0  }
  0x59   : > { %553 = vmatprep.mubr.f32.mxu1 %v1248_v43 }
 0x12a   : > { %v972_v27 = vpop.f32.mrb[0].mxu0 }
 0x12b   : > { %v332_v28 = vpop.f32.mrb[1].mxu0  ;;  %v338_v30 = vadd.f32 %v972_v27, %v907_v26 }
 0x12c   : > { %v333_v29 = vadd.f32 %v907_v26, %v332_v28 }
 0x12d   : > { %v345_v32 = vsel %vm341_vm0, %v338_v30, -inf }
 0x12e   : > { %v342_v31 = vsel %vm341_vm0, %v333_v29, -inf }
 0x12f   : > { %343 = vmax.xlane.f32.xlu0 %v342_v31 }
 0x133   : > { %346 = vmax.xlane.f32.xlu0 %v345_v32 }
 0x1bc   : > { %v344_v33 = vpop.xlane.xlu0 %343 }
 0x1bd   : > { %v348_v34 = vsub.f32 %v333_v29, %v344_v33 }
 0x1bf   : > { %v350_v35 = vmul.f32 1.442695, %v348_v34 }
 0x1c0   : > { %v347_v36 = vpop.xlane.xlu0 %346 }
 0x1c1   : > { %1141 = vpow2.f32 %v350_v35  ;;  %v349_v37 = vsub.f32 %v338_v30, %v347_v36  ;;  %v458_v36 = vld [vmem:[#allocation2 + $0x8] sm:$0xff] }
 0x1c3   : > { %v352_v38 = vmul.f32 1.442695, %v349_v37  ;;  %v460_v37 = vld [vmem:[#allocation2 + $0x28] sm:$0xff] }
 0x1c5   : > { %1143 = vpow2.f32 %v352_v38  ;;  %v457_v38 = vld [vmem:[#allocation2] sm:$0xff] }
 0x1cb   : > { %v1142_v39 = vpop.eup %1141 }
 0x1cc   : > { %v354_v40 = vsel %vm341_vm0, %v1142_v39, 0.0 }
 0x1cd   : > { %355 = vadd.xlane.f32.xlu1 %v354_v40  ;;  %v459_v40 = vld [vmem:[#allocation2 + $0x20] sm:$0xff] }
 0x1cf   : > { %v1144_v41 = vpop.eup %1143 }
 0x1d0   : > { %v357_v42 = vsel %vm341_vm0, %v1144_v41, 0.0 }
 0x1d1   : > { %358 = vadd.xlane.f32.xlu1 %v357_v42  ;;  %v464_v42 = vld [vmem:[#allocation2 + $0x68] sm:$0xff] }
 0x25a   : > { %v356_v44 = vpop.xlane.xlu1 %355 }
 0x25b   : > { %1145 = vrcp.f32 %v356_v44  ;;  %v1012_v44 = vpack.c.bf16 %v459_v40, %v457_v38  ;;  %v677_v38 = vld [vmem:[#allocation2 + $0x30] sm:$0xff]  ;;  %v682_v40 = vld [vmem:[#allocation2 + $0x78] sm:$0xff] }
 0x25e   : > { %v359_v45 = vpop.xlane.xlu1 %358 }
 0x25f   : > { %1147 = vrcp.f32 %v359_v45 }
 0x265   : > { %v1146_v46 = vpop.eup %1145 }
 0x266   : > { %v1441_v47 = vmul.f32 %v1146_v46, %v1142_v39  ;;  %v1010_v39 = vpack.c.bf16 %v460_v37, %v458_v36  ;;  %v461_v46 = vld [vmem:[#allocation2 + $0x40] sm:$0xff]  ;;  %v675_v37 = vld [vmem:[#allocation2 + $0x10] sm:$0xff] }
 0x268   : > { %975 = vmatprep.mubr.msk.f32.mxu0 %vm341_vm0, %v1441_v47  ;;  %v366_v48 = vsel %vm341_vm0, %v1441_v47, -inf  ;;  %1011 = vmatprep.subr.bf16.mxu1 %v1010_v39  ;;  %v680_v39 = vld [vmem:[#allocation2 + $0x58] sm:$0xff] }
 0x269   : > { %v1148_v49 = vpop.eup %1147  ;;  %367 = vmax.xlane.f32.xlu0 %v366_v48  ;;  %v463_v48 = vld [vmem:[#allocation2 + $0x60] sm:$0xff]  ;;  %1013 = vmatpush1.bf16.msra.mxu1 %v1012_v44  ;;  %v679_v44 = vld [vmem:[#allocation2 + $0x50] sm:$0xff] }
 0x26a   : > { %v1447_v50 = vmul.f32 %v1148_v49, %v1144_v41  ;;  %v462_v41 = vld [vmem:[#allocation2 + $0x48] sm:$0xff]  ;;  %v1016_v52 = vpack.c.bf16 %v463_v48, %v461_v46  ;;  %v684_v46 = vld [vmem:[#allocation2 + $0x98] sm:$0xff] }
 0x26b   : > { %v1014_v45 = vpack.c.bf16 %v464_v42, %v462_v41  ;;  %v466_v49 = vld [vmem:[#allocation2 + $0x88] sm:$0xff]  ;;  %v1044_v41 = vpack.c.bf16 %v677_v38, %v675_v37  ;;  %v1046_v42 = vpack.c.bf16 %v682_v40, %v680_v39  ;;  %v686_v48 = vld [vmem:[#allocation2 + $0xb8] sm:$0xff] }
 0x26c   : > { %976 = vmatmul.mubr.msk.f32.vlgmr.msra.gmra.mrb[2].mxu0 %vm341_vm0, %v1447_v50  ;;  %v369_v51 = vsel %vm341_vm0, %v1447_v50, -inf }
 0x26d   : > { %370 = vmax.xlane.f32.xlu1 %v369_v51  ;;  %v468_v51 = vld [vmem:[#allocation2 + $0xa8] sm:$0xff]  ;;  %1015 = vmatprep.subr.bf16.mxu1 %v1014_v45  ;;  %v681_v45 = vld [vmem:[#allocation2 + $0x70] sm:$0xff] }
 0x26e   : > { %1017 = vmatpush1.bf16.msra.mxu1 %v1016_v52  ;;  %v683_v52 = vld [vmem:[#allocation2 + $0x90] sm:$0xff] }
 0x2f6   : > { %v368_v54 = vpop.xlane.xlu0 %367 }
 0x2f7   : > { %vm372_vm2 = vcmp.eq.f32.partialorder %v1441_v47, %v368_v54  ;;  %v1018_v54 = vpack.c.bf16 %v468_v51, %v466_v49  ;;  %v1048_v49 = vpack.c.bf16 %v681_v45, %v679_v44  ;;  %v1050_v51 = vpack.c.bf16 %v686_v48, %v684_v46 }
 0x2f8   : > { %v374_v55 = vsel %vm372_vm2, %v1453_v53, 4 }
 0x2f9   : > { %v376_v56 = vsel %vm341_vm0, %v374_v55, 2147483647  ;;  %v465_v55 = vld [vmem:[#allocation2 + $0x80] sm:$0xff]  ;;  %1019 = vmatprep.subr.bf16.mxu1 %v1018_v54  ;;  %v685_v54 = vld [vmem:[#allocation2 + $0xb0] sm:$0xff] }
 0x2fa   : > { %v371_v57 = vpop.xlane.xlu1 %370  ;;  %v378_v58 = vshra.s32 %v376_v56, 16  ;;  %v377_v2 = vand.u32 65535, %v376_v56  ;;  %v467_v56 = vld [vmem:[#allocation2 + $0xa0] sm:$0xff] }
 0x2fb   : > { %vm373_vm3 = vcmp.eq.f32.partialorder %v1447_v50, %v371_v57  ;;  %v470_v57 = vld [vmem:[#allocation2 + $0xc8] sm:$0xff] }
 0x2fc   : > { %v375_v59 = vsel %vm373_vm3, %v1453_v53, 4  ;;  %v380_v60 = vcvt.s32.f32 %v378_v58  ;;  %v379_v4 = vcvt.s32.f32 %v377_v2  ;;  %v472_v58 = vld [vmem:[#allocation2 + $0xe8] sm:$0xff] }
 0x2fd   : > { %v391_v61 = vsel %vm341_vm0, %v375_v59, 2147483647  ;;  %v1020_v59 = vpack.c.bf16 %v467_v56, %v465_v55  ;;  %v476_v2 = vld [vmem:[#allocation2 + $0x128] sm:$0xff]  ;;  %v688_v55 = vld [vmem:[#allocation2 + $0xd8] sm:$0xff] }
 0x2fe   : > { %381 = vmin.xlane.f32.xlu0 %v380_v60  ;;  %v393_v62 = vshra.s32 %v391_v61, 16  ;;  %v392_v5 = vand.u32 65535, %v391_v61  ;;  %v469_v61 = vld [vmem:[#allocation2 + $0xc0] sm:$0xff]  ;;  %v690_v56 = vld [vmem:[#allocation2 + $0xf8] sm:$0xff] }
 0x2ff   : > { %1021 = vmatpush1.bf16.msra.mxu1 %v1020_v59  ;;  %v687_v59 = vld [vmem:[#allocation2 + $0xd0] sm:$0xff] }
 0x300   : > { %v395_v63 = vcvt.s32.f32 %v393_v62  ;;  %v394_v8 = vcvt.s32.f32 %v392_v5  ;;  %v471_v62 = vld [vmem:[#allocation2 + $0xe0] sm:$0xff] }
 0x301   : > { %v473_v5 = vld [vmem:[#allocation2 + $0x100] sm:$0xff] }
 0x302   : > { %396 = vmin.xlane.f32.xlu1 %v395_v63 }
 0x33f   : > { %v1461_v0 = vpop.f32.mrb[2].mxu0 }
 0x340   : > { %v1463_v1 = vpop.f32.mrb[3].mxu0 }
 0x38b   : > { %v382_v3 = vpop.xlane.xlu0 %381 }
 0x38c   : > { %vm383_vm4 = vcmp.eq.f32.partialorder %v380_v60, %v382_v3  ;;  %v388_v11 = vcvt.f32.s32 %v382_v3  ;;  %v1022_v60 = vpack.c.bf16 %v472_v58, %v470_v57  ;;  %v1024_v3 = vpack.c.bf16 %v471_v62, %v469_v61  ;;  %v692_v61 = vld [vmem:[#allocation2 + $0x118] sm:$0xff] }
 0x38d   : > { %v384_v6 = vsel %vm383_vm4, %v379_v4, inf  ;;  %v1052_v57 = vpack.c.bf16 %v685_v54, %v683_v52  ;;  %v1054_v58 = vpack.c.bf16 %v690_v56, %v688_v55  ;;  %v694_v62 = vld [vmem:[#allocation2 + $0x138] sm:$0xff]  ;;  %v1250_v52 = vmov 3  }
 0x38e   : > { %385 = vmin.xlane.f32.xlu0 %v384_v6  ;;  %v389_v13 = vshll.u32 %v388_v11, 16  ;;  %1023 = vmatprep.subr.bf16.mxu1 %v1022_v60  ;;  %v475_v6 = vld [vmem:[#allocation2 + $0x120] sm:$0xff]  ;;  %v689_v60 = vld [vmem:[#allocation2 + $0xf0] sm:$0xff]  ;;  %v1251_v55 = vmov 1  }
 0x38f   : > { %v397_v7 = vpop.xlane.xlu1 %396  ;;  %1025 = vmatpush1.bf16.msra.mxu1 %v1024_v3  ;;  %v691_v3 = vld [vmem:[#allocation2 + $0x110] sm:$0xff] }
 0x390   : > { %vm398_vm5 = vcmp.eq.f32.partialorder %v395_v63, %v397_v7  ;;  %v403_v14 = vcvt.f32.s32 %v397_v7  ;;  %v474_v63 = vld [vmem:[#allocation2 + $0x108] sm:$0xff] }
 0x391   : > { %v399_v10 = vsel %vm398_vm5, %v394_v8, inf  ;;  %v1026_v4 = vpack.c.bf16 %v476_v2, %v474_v63  ;;  %v478_v7 = vld [vmem:[#allocation2 + $0x148] sm:$0xff]  ;;  %v1056_v63 = vpack.c.bf16 %v689_v60, %v687_v59  ;;  %v1058_v2 = vpack.c.bf16 %v694_v62, %v692_v61 }
 0x392   : > { %400 = vmin.xlane.f32.xlu1 %v399_v10  ;;  %v404_v18 = vshll.u32 %v403_v14, 16  ;;  %v480_v8 = vld [vmem:[#allocation2 + $0x168] sm:$0xff]  ;;  %v1028_v10 = vpack.c.bf16 %v475_v6, %v473_v5  ;;  %v696_v5 = vld [vmem:[#allocation2 + $0x158] sm:$0xff] }
 0x393   : > { %1027 = vmatprep.subr.bf16.mxu1 %v1026_v4  ;;  %v1030_v11 = vpack.c.bf16 %v480_v8, %v478_v7  ;;  %v482_v14 = vld [vmem:[#allocation2 + $0x188] sm:$0xff]  ;;  %v693_v4 = vld [vmem:[#allocation2 + $0x130] sm:$0xff]  ;;  %v698_v6 = vld [vmem:[#allocation2 + $0x178] sm:$0xff] }
 0x394   : > { %1029 = vmatpush1.bf16.msra.mxu1 %v1028_v10  ;;  %v1060_v7 = vpack.c.bf16 %v693_v4, %v691_v3  ;;  %v1062_v8 = vpack.c.bf16 %v698_v6, %v696_v5  ;;  %v695_v10 = vld [vmem:[#allocation2 + $0x150] sm:$0xff] }
 0x395   : > { %1031 = vmatprep.subr.bf16.mxu1 %v1030_v11  ;;  %v697_v11 = vld [vmem:[#allocation2 + $0x170] sm:$0xff] }
 0x41b   : > { %v386_v12 = vpop.xlane.xlu0 %385 }
 0x41c   : > { %v387_v15 = vcvt.f32.s32 %v386_v12  ;;  %v477_v12 = vld [vmem:[#allocation2 + $0x140] sm:$0xff] }
 0x41e   : > { %v1465_v16 = vadd.s32 %v389_v13, %v387_v15  ;;  %v479_v13 = vld [vmem:[#allocation2 + $0x160] sm:$0xff]  ;;  %v484_v15 = vld [vmem:[#allocation2 + $0x1a8] sm:$0xff] }
 0x41f   : > { %v401_v17 = vpop.xlane.xlu1 %400 }
 0x420   : > { %v402_v19 = vcvt.f32.s32 %v401_v17  ;;  %vm406_vm6 = vcmp.eq.s32.totalorder %v1453_v53, %v1465_v16  ;;  %v1032_v17 = vpack.c.bf16 %v479_v13, %v477_v12  ;;  %v700_v12 = vld [vmem:[#allocation2 + $0x198] sm:$0xff] }
 0x421   : > { %v408_v20 = vsel %vm406_vm6, -inf, %v1441_v47  ;;  %v702_v13 = vld [vmem:[#allocation2 + $0x1b8] sm:$0xff] }
 0x422   : > { %v1473_v21 = vadd.s32 %v404_v18, %v402_v19  ;;  %v410_v22 = vsel %vm341_vm0, %v408_v20, -inf  ;;  %v1034_v18 = vpack.c.bf16 %v484_v15, %v482_v14  ;;  %v481_v19 = vld [vmem:[#allocation2 + $0x180] sm:$0xff]  ;;  %1033 = vmatpush1.bf16.msra.mxu1 %v1032_v17  ;;  %v1064_v14 = vpack.c.bf16 %v697_v11, %v695_v10  ;;  %v699_v17 = vld [vmem:[#allocation2 + $0x190] sm:$0xff] }
 0x423   : > { %411 = vmax.xlane.f32.xlu0 %v410_v22  ;;  %v486_v22 = vld [vmem:[#allocation2 + $0x1c8] sm:$0xff]  ;;  %v1066_v15 = vpack.c.bf16 %v702_v13, %v700_v12 }
 0x424   : > { %vm407_vm7 = vcmp.eq.s32.totalorder %v1453_v53, %v1473_v21  ;;  %1035 = vmatprep.subr.bf16.mxu1 %v1034_v18  ;;  %v701_v18 = vld [vmem:[#allocation2 + $0x1b0] sm:$0xff] }
 0x425   : > { %v409_v23 = vsel %vm407_vm7, -inf, %v1447_v50 }
 0x426   : > { %v413_v24 = vsel %vm341_vm0, %v409_v23, -inf }
 0x427   : > { %414 = vmax.xlane.f32.xlu1 %v413_v24 }
 0x4b0   : > { %v412_v26 = vpop.xlane.xlu0 %411 }
 0x4b1   : > { %vm416_vm8 = vcmp.eq.f32.partialorder %v408_v20, %v412_v26  ;;  %v483_v20 = vld [vmem:[#allocation2 + $0x1a0] sm:$0xff] }
 0x4b2   : > { %v418_v27 = vsel %vm416_vm8, %v1453_v53, 4  ;;  %v1036_v24 = vpack.c.bf16 %v483_v20, %v481_v19  ;;  %v704_v19 = vld [vmem:[#allocation2 + $0x1d8] sm:$0xff] }
 0x4b3   : > { %v1485_v28 = vsel %vm341_vm0, %v418_v27, 2147483647  ;;  %v485_v27 = vld [vmem:[#allocation2 + $0x1c0] sm:$0xff]  ;;  %v706_v20 = vld [vmem:[#allocation2 + $0x1f8] sm:$0xff] }
 0x4b4   : > { %v415_v29 = vpop.xlane.xlu1 %414  ;;  %v422_v30 = vshra.s32 %v1485_v28, 16  ;;  %1037 = vmatpush1.bf16.msra.mxu1 %v1036_v24  ;;  %v703_v24 = vld [vmem:[#allocation2 + $0x1d0] sm:$0xff] }
 0x4b5   : > { %vm417_vm9 = vcmp.eq.f32.partialorder %v409_v23, %v415_v29  ;;  %v488_v23 = vld [vmem:[#allocation2 + $0x1e8] sm:$0xff]  ;;  %v487_v29 = vld [vmem:[#allocation2 + $0x1e0] sm:$0xff] }
 0x4b6   : > { %v419_v31 = vsel %vm417_vm9, %v1453_v53, 4  ;;  %v1489_v32 = vcvt.s32.f32 %v422_v30  ;;  %v1038_v26 = vpack.c.bf16 %v488_v23, %v486_v22  ;;  %v676_v30 = vld [vmem:[#allocation2 + $0x18] sm:$0xff]  ;;  %v1068_v22 = vpack.c.bf16 %v701_v18, %v699_v17 }
 0x4b7   : > { %v1492_v33 = vsel %vm341_vm0, %v419_v31, 2147483647  ;;  %v678_v31 = vld [vmem:[#allocation2 + $0x38] sm:$0xff]  ;;  %v1070_v23 = vpack.c.bf16 %v706_v20, %v704_v19 }
 0x4b8   : > { %425 = vmin.xlane.f32.xlu0 %v1489_v32  ;;  %v437_v34 = vshra.s32 %v1492_v33, 16  ;;  %1039 = vmatprep.subr.bf16.mxu1 %v1038_v26  ;;  %v1042_v36 = vpack.c.bf16 %v678_v31, %v676_v30  ;;  %v705_v26 = vld [vmem:[#allocation2 + $0x1f0] sm:$0xff] }
 0x4ba   : > { %v1496_v35 = vcvt.s32.f32 %v437_v34  ;;  %v1040_v34 = vpack.c.bf16 %v487_v29, %v485_v27  ;;  %v1072_v27 = vpack.c.bf16 %v705_v26, %v703_v24  ;;  %v421_v29 = vand.u32 65535, %v1485_v28 }
 0x4bc   : > { %440 = vmin.xlane.f32.xlu1 %v1496_v35  ;;  %1041 = vmatpush1.bf16.msra.mxu1 %v1040_v34  ;;  %v423_v31 = vcvt.s32.f32 %v421_v29  ;;  %v436_v34 = vand.u32 65535, %v1492_v33 }
 0x4bd   : > { %1043 = vmatprep.subr.bf16.mxu1 %v1042_v36 }
 0x4be   : > { %v438_v38 = vcvt.s32.f32 %v436_v34 }
 0x4bf   : > { %554 = vmatmul.mubr.f32.vlgmr.msra.gmra.mrb[0].mxu1 %v1394_v9 }
 0x4c0   : > { %1045 = vmatpush1.bf16.msra.mxu1 %v1044_v41  ;;  %559 = vmatprep.mubr.f32.mxu1 %v1248_v43 }
 0x4c1   : > { %1047 = vmatprep.subr.bf16.mxu1 %v1046_v42 }
 0x4c3   : > { %560 = vmatmul.mubr.f32.gmra.mrb[2].mxu1 %v1428_v25 }
 0x4c4   : > { %1049 = vmatpush1.bf16.msra.mxu1 %v1048_v49  ;;  %771 = vmatprep.mubr.f32.mxu1 %v1248_v43 }
 0x4c5   : > { %1051 = vmatprep.subr.bf16.mxu1 %v1050_v51 }
 0x4c8   : > { %1053 = vmatpush1.bf16.msra.mxu1 %v1052_v57 }
 0x4c9   : > { %1055 = vmatprep.subr.bf16.mxu1 %v1054_v58 }
 0x4cc   : > { %1057 = vmatpush1.bf16.msra.mxu1 %v1056_v63 }
 0x4cd   : > { %1059 = vmatprep.subr.bf16.mxu1 %v1058_v2 }
 0x4d0   : > { %1061 = vmatpush1.bf16.msra.mxu1 %v1060_v7 }
 0x4d1   : > { %1063 = vmatprep.subr.bf16.mxu1 %v1062_v8 }
 0x4d4   : > { %1065 = vmatpush1.bf16.msra.mxu1 %v1064_v14 }
 0x4d5   : > { %1067 = vmatprep.subr.bf16.mxu1 %v1066_v15 }
 0x4d8   : > { %1069 = vmatpush1.bf16.msra.mxu1 %v1068_v22 }
 0x4d9   : > { %1071 = vmatprep.subr.bf16.mxu1 %v1070_v23 }
 0x4dc   : > { %1073 = vmatpush1.bf16.msra.mxu1 %v1072_v27 }
 0x4df   : > { %772 = vmatmul.mubr.f32.vlgmr.msra.gmra.mrb[4].mxu1 %v1394_v9  ;;  %v1249_v9 = vmov 0  }
 0x4e0   : > { %777 = vmatprep.mubr.f32.mxu1 %v1248_v43  ;;  %1133 = vset.pattern.permute.xlu0 %v1249_v9 }
 0x4e1   : > { %1134 = vset.pattern.permute.xlu1 %v1249_v9 }
 0x4e3   : > { %778 = vmatmul.mubr.f32.gmra.mrb[6].mxu1 %v1428_v25 }
 0x545   : > { %v426_v30 = vpop.xlane.xlu0 %425 }
 0x546   : > { %vm427_vm10 = vcmp.eq.f32.partialorder %v1489_v32, %v426_v30  ;;  %v432_v28 = vcvt.f32.s32 %v426_v30 }
 0x547   : > { %v428_v36 = vsel %vm427_vm10, %v423_v31, inf }
 0x548   : > { %429 = vmin.xlane.f32.xlu0 %v428_v36  ;;  %v433_v41 = vshll.u32 %v432_v28, 16 }
 0x549   : > { %v441_v37 = vpop.xlane.xlu1 %440 }
 0x54a   : > { %vm442_vm11 = vcmp.eq.f32.partialorder %v1496_v35, %v441_v37  ;;  %v447_v42 = vcvt.f32.s32 %v441_v37 }
 0x54b   : > { %v443_v39 = vsel %vm442_vm11, %v438_v38, inf }
 0x54c   : > { %444 = vmin.xlane.f32.xlu1 %v443_v39  ;;  %v448_v45 = vshll.u32 %v447_v42, 16 }
 0x592   : > { %v555_v25 = vpop.f32.mrb[0].mxu1 }
 0x593   : > { %v557_v43 = vpop.f32.mrb[1].mxu1 }
 0x596   : > { %v561_v49 = vpop.f32.mrb[2].mxu1 }
 0x597   : > { %v563_v54 = vpop.f32.mrb[3].mxu1 }
 0x5b2   : > { %v773_v16 = vpop.f32.mrb[4].mxu1 }
 0x5b3   : > { %v775_v56 = vpop.f32.mrb[5].mxu1 }
 0x5b6   : > { %v779_v57 = vpop.f32.mrb[6].mxu1 }
 0x5d5   : > { %v430_v40 = vpop.xlane.xlu0 %429 }
 0x5d6   : > { %v431_v33 = vcvt.f32.s32 %v430_v40 }
 0x5d8   : > { %v434_v44 = vadd.s32 %v433_v41, %v431_v33 }
 0x5d9   : > { %v445_v32 = vpop.xlane.xlu1 %444 }
 0x5da   : > { %vm450_vm12 = vcmp.eq.s32.totalorder %v1453_v53, %v434_v44  ;;  %v446_v46 = vcvt.f32.s32 %v445_v32 }
 0x5db   : > { %vm452_vm13 = vmor %vm406_vm6, %vm450_vm12 }
 0x5dc   : > { %v449_v35 = vadd.s32 %v448_v45, %v446_v46  ;;  %v454_v48 = vsel %vm452_vm13, %v1441_v47, 0.0  ;;  %v1252_v47 = vmov 2  }
 0x5dd   : > { %568 = vperm.xlu0 %1133, %v454_v48  }
 0x5de   : > { %vm451_vm14 = vcmp.eq.s32.totalorder %v1453_v53, %v449_v35 }
 0x5df   : > { %vm453_vm15 = vmor %vm407_vm7, %vm451_vm14 }
 0x5e0   : > { %v455_v51 = vsel %vm453_vm15, %v1447_v50, 0.0  ;;  %v781_v50 = vpop.f32.mrb[7].mxu1 }
 0x5e1   : > { %573 = vperm.xlu1 %1134, %v455_v51   ;;  %1140 = vset.pattern.permute.xlu0 %v1250_v52 }
 0x5e5   : > { %1135 = vset.pattern.permute.xlu1 %v1251_v55 }
 0x5e6   : > { %668 = vperm.xlu1 %1135, %v455_v51  }
 0x5ea   : > { %1136 = vset.pattern.permute.xlu1 %v1252_v47 }
 0x5eb   : > { %789 = vperm.xlu1 %1136, %v455_v51  }
 0x5ef   : > { %1137 = vset.pattern.permute.xlu1 %v1251_v55 }
 0x5f0   : > { %664 = vperm.xlu1 %1137, %v454_v48  }
 0x5f4   : > { %1138 = vset.pattern.permute.xlu1 %v1252_v47 }
 0x5f5   : > { %785 = vperm.xlu1 %1138, %v454_v48  }
 0x5f9   : > { %1139 = vset.pattern.permute.xlu1 %v1250_v52 }
 0x5fa   : > { %797 = vperm.xlu1 %1139, %v454_v48  }
 0x5fe   : > { %801 = vperm.xlu1 %1139, %v455_v51  }
 0x65c   : > { %v569_v53 = vpop.permute.xlu0 %568 }
 0x65d   : > { %v576_v21 = vmul.f32 %v569_v53, %v555_v25 }
 0x65f   : > { %v655_v58 = vadd.f32 %v1463_v1, %v576_v21 }
 0x660   : > { %v574_v59 = vpop.permute.xlu1 %573 }
 0x661   : > { %v577_v60 = vmul.f32 %v574_v59, %v561_v49 }
 0x663   : > { %v660_v61 = vadd.f32 %v1461_v0, %v577_v60 }
 0x665   : > { %v669_v62 = vpop.permute.xlu1 %668 }
 0x666   : > { %v672_v63 = vmul.f32 %v669_v62, %v563_v54 }
 0x668   : > { %v674_v2 = vadd.f32 %v672_v63, %v660_v61 }
 0x66a   : > { %v790_v3 = vpop.permute.xlu1 %789 }
 0x66b   : > { %v793_v4 = vmul.f32 %v790_v3, %v779_v57 }
 0x66d   : > { %v795_v5 = vadd.f32 %v793_v4, %v674_v2 }
 0x66f   : > { %v665_v6 = vpop.permute.xlu1 %664 }
 0x670   : > { %v671_v7 = vmul.f32 %v665_v6, %v557_v43 }
 0x672   : > { %v673_v8 = vadd.f32 %v671_v7, %v655_v58 }
 0x674   : > { %v786_v10 = vpop.permute.xlu1 %785 }
 0x675   : > { %v792_v11 = vmul.f32 %v786_v10, %v773_v16 }
 0x677   : > { %v794_v12 = vadd.f32 %v792_v11, %v673_v8 }
 0x679   : > { %v798_v1 = vpop.permute.xlu1 %797 }
 0x67a   : > { %v804_v13 = vmul.f32 %v798_v1, %v775_v56 }
 0x67c   : > { %v806_v0 = vadd.f32 %v804_v13, %v794_v12 }
 0x67d   : > { %v802_v14 = vpop.permute.xlu1 %801 }
 0x67e   : > { %808 = vst [vmem:[%s233_s16] sm:$0xff] %v806_v0  ;;  %v805_v15 = vmul.f32 %v802_v14, %v781_v50 }
 0x680   : > { %v807_v17 = vadd.f32 %v805_v15, %v795_v5 }
 0x682   : > { %809 = vst [vmem:[%s233_s16 + $0x8] sm:$0xff] %v807_v17 }
 0x683   : > { %1190 = shalt.err (!%p1187_p7)
}
 0x684   : > { %s1191_s30 = scalar_lea.hbm %s1530_s10, 256  ;;  %s1195_s13 = scalar_lea.hbm %s1578_s5, 512 }
 0x685   : > { %p1192_p8 = scmp.ne.s32.totalorder %s1530_s10, %s1191_s30  ;;  %p1196_p1 = scmp.lt.u32.totalorder %s1530_s10, %s1578_s5 }
 0x686   : > { %p1197_p0 = scmp.lt.u32.totalorder %s1195_s13, %s1191_s30  ;;  %p1199_p6 = scmp.lt.u32.totalorder %s1191_s30, %s1530_s10 }
 0x687   : > { %p1193_p11 = pnand %p1192_p8, %p1589_p9 }
 0x688   : > { %p1198_p5 = por %p1197_p0, %p1196_p1 }
 0x689   : > { %p1194_p13 = pneg %p1193_p11 }
 0x68a   : > { %p1200_p10 = por %p1199_p6, %p1198_p5 }
 0x68c   : > { %p1201_p12 = pnand %p1200_p10, %p1194_p13 }
 0x68e   : > { %1204 = shalt.err (!%p1201_p12)
}
 0x68f   : > { %s1254_s16 = smov 128   ;;  %s1255_s23 = smov 8  }
 0x690   : > { %1078 = dma.vmem_to_hbm [thread:$0]  (%p1589_p9), %s1525_s17, 256, %s1530_s10, %s1532_s8, %s1254_s16, %s1254_s16, %s1255_s23  }
 0x691 PF: > { %p1090_p2 = scmp.ge.s32.totalorder %s1243_s21, 2  ;;  %s839_s25 = sand.u32 1, %s1231_s18  }
 0x692   : > { %p1590_p3 = scmp.ne.s32.totalorder %s1583_s29, 0  ;;  %s840_s26 = scalar_lea.sflag [#allocation4], %s839_s25 }
 0x694   : > { %p1085_p4 = pnand %p1090_p2, %p1590_p3 }
 0x696   : > { %1226 = dma.done.wait (!%p1085_p4), %s840_s26, 256  }
 0x697   : > { %1228 = vsyncadd (!%p1085_p4), %s840_s26, 4294967040  ;;  %p16_p7 = scmp.ge.s32.totalorder %s1311_s24, 4   ;;  %s1591_s18 = smov %s1235_s19 }
 0x698   : > { %s1592_s19 = smov %s1239_s20  ;;  %s1593_s20 = smov %s1322_s27 }
 0x699   : > { %s1594_s21 = smov %s1311_s24  ;;  %18 = sbr.rel (!%p16_p7) target bundleno = 4 (0x4), region = 80 }
 0x6a0   :  { %845 = vsyncpa [#allocation3], 1 }
 0x6a1   :  { %847 = vsyncpa [#allocation3 + $0x1], 1 }
 0x6a2   :  { %848 = vsyncpa [#allocation4], 1 }
 0x6a3   :  { %850 = vsyncpa [#allocation4 + $0x1], 1 }

</bundles_post_ra>
